<compile_context>
chip_gen: v6e
topology: v6e:2x2x1
jax: 0.10.0
libtpu: 0.0.40
codegen_flags: <defaults>
</compile_context>

<pallas_src>
import jax
import jax.numpy as jnp
from jax import lax
from jax.experimental import pallas as pl
from jax.experimental.pallas import tpu as pltpu


def _shift_conv_kernel(xm_ref, xt_ref, xb_ref, w_ref, b_ref, o_ref):
    # xm_ref: (1, Cin, th, W)   main row block (NCHW)
    # xt_ref: (1, g, 8, W)      8 rows ending just above the block, channels [3g:4g)
    # xb_ref: (1, g, 8, W)      8 rows starting just below the block, channels [2g:3g)
    # w_ref : (Cout, Cin)       fused per-tap weights (SMEM scalars)
    # b_ref : (Cout,)           bias (SMEM scalars)
    # o_ref : (1, Cout, th, W)
    i = pl.program_id(1)
    nhb = pl.num_programs(1)

    Cin = xm_ref.shape[1]
    g = xt_ref.shape[1]
    Cout, th, W = o_ref.shape[1], o_ref.shape[2], o_ref.shape[3]
    f32 = jnp.float32

    # Halo rows (row just above / below the block).  Use a select, not a
    # multiply-by-zero, so border outputs see true zero padding even if the
    # clamped halo re-read contains NaN/Inf.
    top_raw = xt_ref[0, :, 7:8, :].astype(f32)                     # (g, 1, W)
    bot_raw = xb_ref[0, :, 0:1, :].astype(f32)                     # (g, 1, W)
    top_rows = jnp.where(i > 0, top_raw, jnp.zeros_like(top_raw))
    bot_rows = jnp.where(i < nhb - 1, bot_raw, jnp.zeros_like(bot_raw))

    # Shifts via XLU rotates + one VPU select (no misaligned-slice concats ->
    # no VMEM scratch copies) whenever the lane dim is dense.
    use_roll = (W % 128 == 0)
    col = lax.broadcasted_iota(jnp.int32, (1, W), 1)
    row = lax.broadcasted_iota(jnp.int32, (th, 1), 0)
    zcol = jnp.zeros((th, 1), f32)

    def shift_w(p, d):
        # out[h, w] = p[h, w + d], zero where w + d falls outside the image.
        if use_roll:
            r = pltpu.roll(p, shift=(-d) % W, axis=1)
            return jnp.where(col == ((W - 1) if d > 0 else 0), 0.0, r)
        # Lane-sparse fallback (known-good slice+concat path).
        if d > 0:
            return jnp.concatenate([p[:, 1:], zcol], axis=1)
        return jnp.concatenate([zcol, p[:, :W - 1]], axis=1)

    def shift_h(p, d, halo_row):
        # out[h, w] = p[h + d, w]; the row entering from outside the block is
        # spliced in from the halo fetch (already zeroed at image borders).
        if use_roll:
            r = pltpu.roll(p, shift=(-d) % th, axis=0)
            return jnp.where(row == ((th - 1) if d > 0 else 0), halo_row, r)
        if d > 0:
            return jnp.concatenate([p[1:, :], halo_row], axis=0)
        return jnp.concatenate([halo_row, p[:th - 1, :]], axis=0)

    # Per-channel shifted planes, read channel-by-channel straight off the ref
    # (no full-block f32 materialization).
    planes = []
    for c in range(Cin):
        p = xm_ref[0, c].astype(f32)                               # (th, W)
        if c < 1 * g:
            planes.append(shift_w(p, +1))                          # x[h, w+1]
        elif c < 2 * g:
            planes.append(shift_w(p, -1))                          # x[h, w-1]
        elif c < 3 * g:
            planes.append(shift_h(p, +1, bot_rows[c - 2 * g]))     # x[h+1, w]
        elif c < 4 * g:
            planes.append(shift_h(p, -1, top_rows[c - 3 * g]))     # x[h-1, w]
        else:
            planes.append(p)                                       # x[h, w]

    # Channel mix on the VPU: Cout*Cin scalar-broadcast FMAs over (th, W),
    # blocked over output channels for independent accumulator chains.
    CO_BLK = 4
    for co0 in range(0, Cout, CO_BLK):
        cos = list(range(co0, min(co0 + CO_BLK, Cout)))
        # Bias folded into the first FMA (no per-channel full-plane broadcast).
        accs = [w_ref[co, 0] * planes[0] + b_ref[co] for co in cos]
        for c in range(1, Cin):
            pc = planes[c]
            for j, co in enumerate(cos):
                accs[j] = accs[j] + w_ref[co, c] * pc
        for j, co in enumerate(cos):
            o_ref[0, co] = accs[j].astype(o_ref.dtype)


def _block_vmem_bytes(Cin, Cout, g, th, W, in_elt, out_elt):
    """Rough double-buffered VMEM footprint of one grid step."""
    main = Cin * th * W * in_elt
    halo = 2 * g * 8 * W * in_elt
    out = Cout * th * W * out_elt
    scratch = (Cin + 4) * th * W * 4          # f32 shifted planes + accumulators
    return 2 * (main + halo + out) + scratch


def _pick_row_block(N, Cin, Cout, g, H, W, in_elt, out_elt):
    """Largest row block that fits the VMEM budget and keeps >= 4 grid steps."""
    cands = [t for t in range(8, H + 1, 8) if H % t == 0]
    if not cands:
        raise ValueError(f"H must be a multiple of 8 (got H={H})")
    budget = 36 * 1024 * 1024     # headroom under v7x's 64 MiB VMEM
    viable = [t for t in cands
              if _block_vmem_bytes(Cin, Cout, g, t, W, in_elt, out_elt) <= budget]
    if not viable:
        viable = [min(cands)]
    for t in sorted(viable, reverse=True):
        if N * (H // t) >= 4:     # feed both v7x TensorCores + deepen pipeline
            return t
    return min(viable)            # maximize step count if H is tiny


def _validate_mask(mask, Cin, Cout, g):
    """Check the mask has the one-tap-per-channel structure w_fused assumes."""
    exp = jnp.zeros((Cout, Cin, 3, 3), jnp.float32)
    exp = exp.at[:, 0 * g:1 * g, 1, 2].set(1.0)
    exp = exp.at[:, 1 * g:2 * g, 1, 0].set(1.0)
    exp = exp.at[:, 2 * g:3 * g, 2, 1].set(1.0)
    exp = exp.at[:, 3 * g:4 * g, 0, 1].set(1.0)
    exp = exp.at[:, 4 * g:, 1, 1].set(1.0)
    try:
        ok = bool(jnp.all((mask != 0) == (exp != 0)))
    except Exception:
        return                    # traced/abstract mask: skip the host-side check
    if not ok:
        raise ValueError("mask does not match the ShiftConv2d0 one-tap-per-channel "
                         "structure required by the fused-weight kernel")


def shift_conv2d0_pallas(x, w, b, mask, *, row_block=None):
    """Forward of ShiftConv2d0: conv2d(x, w*mask, bias, stride=1, pad=1), NCHW."""
    N, Cin, H, W = x.shape
    Cout = w.shape[0]
    g = Cin // 5
    if g < 1:
        raise ValueError("inp_channels must be >= 5 (n_div = 5)")

    _validate_mask(mask, Cin, Cout, g)

    # Each (o, c) pair has exactly one nonzero 3x3 tap after masking, so summing
    # the masked taps yields the fused (Cout, Cin) channel-mix matrix.
    w_fused = (w * mask).sum(axis=(2, 3)).astype(jnp.float32)      # (Cout, Cin)
    b_f = b.astype(jnp.float32)                                    # (Cout,)

    in_elt = jnp.dtype(x.dtype).itemsize
    out_elt = in_elt
    if row_block is None:
        row_block = _pick_row_block(N, Cin, Cout, g, H, W, in_elt, out_elt)
    th = row_block
    if H % th != 0 or th % 8 != 0:
        raise ValueError(f"H must be a multiple of 8 and of row_block "
                         f"(got H={H}, row_block={th})")
    nhb = H // th          # number of row blocks
    hb8 = th // 8          # 8-row tiles per row block
    nh8 = H // 8           # 8-row tiles per image

    blk_bytes = _block_vmem_bytes(Cin, Cout, g, th, W, in_elt, out_elt)
    vmem_limit = int(min(48 * 1024 * 1024,
                         max(32 * 1024 * 1024, blk_bytes + 8 * 1024 * 1024)))

    in_specs = [
        # Main row block: all channels, th rows.
        pl.BlockSpec((1, Cin, th, W), lambda n, i: (n, 0, i, 0)),
        # Top halo: 8 rows ending just above the block, only channels [3g:4g).
        pl.BlockSpec((1, g, 8, W),
                     lambda n, i: (n, 3, jnp.maximum(i * hb8 - 1, 0), 0)),
        # Bottom halo: 8 rows starting just below the block, channels [2g:3g).
        pl.BlockSpec((1, g, 8, W),
                     lambda n, i: (n, 2, jnp.minimum((i + 1) * hb8, nh8 - 1), 0)),
        # Tiny fused weight + bias live in SMEM and are read as scalars.
        pl.BlockSpec(memory_space=pltpu.MemorySpace.SMEM),
        pl.BlockSpec(memory_space=pltpu.MemorySpace.SMEM),
    ]

    out = pl.pallas_call(
        _shift_conv_kernel,
        out_shape=jax.ShapeDtypeStruct((N, Cout, H, W), x.dtype),
        grid_spec=pltpu.PrefetchScalarGridSpec(
            num_scalar_prefetch=0,
            grid=(N, nhb),
            in_specs=in_specs,
            out_specs=pl.BlockSpec((1, Cout, th, W), lambda n, i: (n, 0, i, 0)),
        ),
        compiler_params=pltpu.CompilerParams(
            dimension_semantics=("parallel", "parallel"),
            vmem_limit_bytes=vmem_limit),
    )(x, x, x, w_fused, b_f)
    return out


def make_shift_conv2d0_params(inp_channels, out_channels, key):
    """Deterministic parameter init mirroring ShiftConv2d0.__init__ shapes."""
    n_div = 5
    g = inp_channels // n_div

    kw, kb = jax.random.split(key)
    fan_in = inp_channels * 3 * 3
    bound = 1.0 / (fan_in ** 0.5)
    w = jax.random.uniform(kw, (out_channels, inp_channels, 3, 3),
                           minval=-bound, maxval=bound, dtype=jnp.float32)
    b = jax.random.uniform(kb, (out_channels,),
                           minval=-bound, maxval=bound, dtype=jnp.float32)

    mask = jnp.zeros((out_channels, inp_channels, 3, 3), dtype=jnp.float32)
    mask = mask.at[:, 0 * g:1 * g, 1, 2].set(1.0)
    mask = mask.at[:, 1 * g:2 * g, 1, 0].set(1.0)
    mask = mask.at[:, 2 * g:3 * g, 2, 1].set(1.0)
    mask = mask.at[:, 3 * g:4 * g, 0, 1].set(1.0)
    mask = mask.at[:, 4 * g:, 1, 1].set(1.0)
    return w, b, mask


def _reference_conv(x_nchw, w_oihw, bias, mask_oihw):
    y = lax.conv_general_dilated(
        x_nchw, w_oihw * mask_oihw,
        window_strides=(1, 1), padding=((1, 1), (1, 1)),
        dimension_numbers=("NCHW", "OIHW", "NCHW"))
    return y + bias.reshape(1, -1, 1, 1)


if __name__ == "__main__":
    key = jax.random.PRNGKey(0)
    k_x, k_p, k_x2 = jax.random.split(key, 3)

    inp_channels, out_channels = 10, 8
    N, H, W = 2, 16, 128          # lane-dense W (multiple of 128), roll fast path

    x = jax.random.normal(k_x, (N, inp_channels, H, W), dtype=jnp.float32)
    w, b, mask = make_shift_conv2d0_params(inp_channels, out_channels, k_p)

    # Auto row_block -> 8: grid (2, 2), exercises halo splicing + both TCs on v7x.
    y = jax.block_until_ready(shift_conv2d0_pallas(x, w, b, mask))
    y_ref = _reference_conv(x, w, b, mask)
    assert y.shape == (N, out_channels, H, W)
    assert jnp.allclose(y, y_ref, atol=1e-5, rtol=1e-5), \
        float(jnp.max(jnp.abs(y - y_ref)))

    # Lane-sparse W exercises the slice+concat fallback for the +/-1 column shifts.
    x2 = jax.random.normal(k_x2, (N, inp_channels, H, 16), dtype=jnp.float32)
    y2 = jax.block_until_ready(shift_conv2d0_pallas(x2, w, b, mask, row_block=8))
    y2_ref = _reference_conv(x2, w, b, mask)
    assert jnp.allclose(y2, y2_ref, atol=1e-5, rtol=1e-5), \
        float(jnp.max(jnp.abs(y2 - y2_ref)))

    print("KERNEL_OK")
</pallas_src>

<mosaic_0001>
module attributes {stable_mosaic.version = 11 : i64} {
  func.func @_shift_conv_kernel(%arg0: i32, %arg1: i32, %arg2: memref<1x10x8x128xf32, #tpu.memory_space<vmem>>, %arg3: memref<1x2x8x128xf32, #tpu.memory_space<vmem>>, %arg4: memref<1x2x8x128xf32, #tpu.memory_space<vmem>>, %arg5: memref<8x10xf32, #tpu.memory_space<smem>>, %arg6: memref<8xf32, #tpu.memory_space<smem>>, %arg7: memref<1x8x8x128xf32, #tpu.memory_space<vmem>>) attributes {dimension_semantics = [#tpu.dimension_semantics<parallel>, #tpu.dimension_semantics<parallel>], iteration_bounds = array<i64: 2, 2>, scalar_prefetch = 0 : i64, scratch_operands = 0 : i64, tpu.core_type = #tpu.core_type<tc>, window_params = [{transform_indices = @transform_0, window_bounds = array<i64: 1, 10, 8, 128>}, {transform_indices = @transform_1, window_bounds = array<i64: 1, 2, 8, 128>}, {transform_indices = @transform_2, window_bounds = array<i64: 1, 2, 8, 128>}, {transform_indices = @transform_3, window_bounds = array<i64: 8, 10>}, {transform_indices = @transform_4, window_bounds = array<i64: 8>}, {transform_indices = @transform_5, window_bounds = array<i64: 1, 8, 8, 128>}]} {
    %c0 = arith.constant 0 : index
    %c0_0 = arith.constant 0 : index
    %c7 = arith.constant 7 : index
    %c0_1 = arith.constant 0 : index
    %0 = vector.load %arg3[%c0, %c0_0, %c7, %c0_1] : memref<1x2x8x128xf32, #tpu.memory_space<vmem>>, vector<1x2x1x128xf32>
    %1 = vector.shape_cast %0 : vector<1x2x1x128xf32> to vector<2x1x128xf32>
    %c0_2 = arith.constant 0 : index
    %c0_3 = arith.constant 0 : index
    %c0_4 = arith.constant 0 : index
    %c0_5 = arith.constant 0 : index
    %2 = vector.load %arg4[%c0_2, %c0_3, %c0_4, %c0_5] : memref<1x2x8x128xf32, #tpu.memory_space<vmem>>, vector<1x2x1x128xf32>
    %3 = vector.shape_cast %2 : vector<1x2x1x128xf32> to vector<2x1x128xf32>
    %c0_i32 = arith.constant 0 : i32
    %4 = arith.cmpi sgt, %arg1, %c0_i32 : i32
    %cst = arith.constant 0.000000e+00 : f32
    %5 = vector.broadcast %cst : f32 to vector<2x1x128xf32>
    %6 = arith.select %4, %1, %5 : vector<2x1x128xf32>
    %c1_i32 = arith.constant 1 : i32
    %7 = arith.cmpi slt, %arg1, %c1_i32 : i32
    %cst_6 = arith.constant 0.000000e+00 : f32
    %8 = vector.broadcast %cst_6 : f32 to vector<2x1x128xf32>
    %9 = arith.select %7, %3, %8 : vector<2x1x128xf32>
    %10 = tpu.iota {dimensions = array<i32: 1>} : vector<1x128xi32>
    %11 = tpu.iota {dimensions = array<i32: 0>} : vector<8x1xi32>
    %c0_7 = arith.constant 0 : index
    %c0_8 = arith.constant 0 : index
    %c0_9 = arith.constant 0 : index
    %c0_10 = arith.constant 0 : index
    %12 = vector.load %arg2[%c0_7, %c0_8, %c0_9, %c0_10] : memref<1x10x8x128xf32, #tpu.memory_space<vmem>>, vector<1x1x8x128xf32>
    %13 = vector.shape_cast %12 : vector<1x1x8x128xf32> to vector<8x128xf32>
    %c127_i32 = arith.constant 127 : i32
    %14 = tpu.dynamic_rotate %13 by %c127_i32 dim 1 : vector<8x128xf32>, i32 -> vector<8x128xf32>
    %c127_i32_11 = arith.constant 127 : i32
    %15 = vector.broadcast %c127_i32_11 : i32 to vector<1x128xi32>
    %16 = arith.cmpi eq, %10, %15 : vector<1x128xi32>
    %cst_12 = arith.constant 0.000000e+00 : f32
    %17 = vector.shape_cast %16 : vector<1x128xi1> to vector<1x128xi1>
    %18 = vector.broadcast %17 : vector<1x128xi1> to vector<8x128xi1>
    %19 = vector.broadcast %cst_12 : f32 to vector<8x128xf32>
    %20 = arith.select %18, %19, %14 : vector<8x128xi1>, vector<8x128xf32>
    %c0_13 = arith.constant 0 : index
    %c1 = arith.constant 1 : index
    %c0_14 = arith.constant 0 : index
    %c0_15 = arith.constant 0 : index
    %21 = vector.load %arg2[%c0_13, %c1, %c0_14, %c0_15] : memref<1x10x8x128xf32, #tpu.memory_space<vmem>>, vector<1x1x8x128xf32>
    %22 = vector.shape_cast %21 : vector<1x1x8x128xf32> to vector<8x128xf32>
    %c127_i32_16 = arith.constant 127 : i32
    %23 = tpu.dynamic_rotate %22 by %c127_i32_16 dim 1 : vector<8x128xf32>, i32 -> vector<8x128xf32>
    %c127_i32_17 = arith.constant 127 : i32
    %24 = vector.broadcast %c127_i32_17 : i32 to vector<1x128xi32>
    %25 = arith.cmpi eq, %10, %24 : vector<1x128xi32>
    %cst_18 = arith.constant 0.000000e+00 : f32
    %26 = vector.shape_cast %25 : vector<1x128xi1> to vector<1x128xi1>
    %27 = vector.broadcast %26 : vector<1x128xi1> to vector<8x128xi1>
    %28 = vector.broadcast %cst_18 : f32 to vector<8x128xf32>
    %29 = arith.select %27, %28, %23 : vector<8x128xi1>, vector<8x128xf32>
    %c0_19 = arith.constant 0 : index
    %c2 = arith.constant 2 : index
    %c0_20 = arith.constant 0 : index
    %c0_21 = arith.constant 0 : index
    %30 = vector.load %arg2[%c0_19, %c2, %c0_20, %c0_21] : memref<1x10x8x128xf32, #tpu.memory_space<vmem>>, vector<1x1x8x128xf32>
    %31 = vector.shape_cast %30 : vector<1x1x8x128xf32> to vector<8x128xf32>
    %c1_i32_22 = arith.constant 1 : i32
    %32 = tpu.dynamic_rotate %31 by %c1_i32_22 dim 1 : vector<8x128xf32>, i32 -> vector<8x128xf32>
    %c0_i32_23 = arith.constant 0 : i32
    %33 = vector.broadcast %c0_i32_23 : i32 to vector<1x128xi32>
    %34 = arith.cmpi eq, %10, %33 : vector<1x128xi32>
    %cst_24 = arith.constant 0.000000e+00 : f32
    %35 = vector.shape_cast %34 : vector<1x128xi1> to vector<1x128xi1>
    %36 = vector.broadcast %35 : vector<1x128xi1> to vector<8x128xi1>
    %37 = vector.broadcast %cst_24 : f32 to vector<8x128xf32>
    %38 = arith.select %36, %37, %32 : vector<8x128xi1>, vector<8x128xf32>
    %c0_25 = arith.constant 0 : index
    %c3 = arith.constant 3 : index
    %c0_26 = arith.constant 0 : index
    %c0_27 = arith.constant 0 : index
    %39 = vector.load %arg2[%c0_25, %c3, %c0_26, %c0_27] : memref<1x10x8x128xf32, #tpu.memory_space<vmem>>, vector<1x1x8x128xf32>
    %40 = vector.shape_cast %39 : vector<1x1x8x128xf32> to vector<8x128xf32>
    %c1_i32_28 = arith.constant 1 : i32
    %41 = tpu.dynamic_rotate %40 by %c1_i32_28 dim 1 : vector<8x128xf32>, i32 -> vector<8x128xf32>
    %c0_i32_29 = arith.constant 0 : i32
    %42 = vector.broadcast %c0_i32_29 : i32 to vector<1x128xi32>
    %43 = arith.cmpi eq, %10, %42 : vector<1x128xi32>
    %cst_30 = arith.constant 0.000000e+00 : f32
    %44 = vector.shape_cast %43 : vector<1x128xi1> to vector<1x128xi1>
    %45 = vector.broadcast %44 : vector<1x128xi1> to vector<8x128xi1>
    %46 = vector.broadcast %cst_30 : f32 to vector<8x128xf32>
    %47 = arith.select %45, %46, %41 : vector<8x128xi1>, vector<8x128xf32>
    %c0_31 = arith.constant 0 : index
    %c4 = arith.constant 4 : index
    %c0_32 = arith.constant 0 : index
    %c0_33 = arith.constant 0 : index
    %48 = vector.load %arg2[%c0_31, %c4, %c0_32, %c0_33] : memref<1x10x8x128xf32, #tpu.memory_space<vmem>>, vector<1x1x8x128xf32>
    %49 = vector.shape_cast %48 : vector<1x1x8x128xf32> to vector<8x128xf32>
    %50 = vector.extract_strided_slice %9 {offsets = [0, 0, 0], sizes = [1, 1, 128], strides = [1, 1, 1]} : vector<2x1x128xf32> to vector<1x1x128xf32>
    %51 = vector.shape_cast %50 : vector<1x1x128xf32> to vector<1x128xf32>
    %c7_i32 = arith.constant 7 : i32
    %52 = tpu.dynamic_rotate %49 by %c7_i32 dim 0 : vector<8x128xf32>, i32 -> vector<8x128xf32>
    %c7_i32_34 = arith.constant 7 : i32
    %53 = vector.broadcast %c7_i32_34 : i32 to vector<8x1xi32>
    %54 = arith.cmpi eq, %11, %53 : vector<8x1xi32>
    %55 = vector.shape_cast %54 : vector<8x1xi1> to vector<8x1xi1>
    %56 = vector.broadcast %55 : vector<8x1xi1> to vector<8x128xi1>
    %57 = vector.shape_cast %51 : vector<1x128xf32> to vector<1x128xf32>
    %58 = vector.broadcast %57 : vector<1x128xf32> to vector<8x128xf32>
    %59 = arith.select %56, %58, %52 : vector<8x128xi1>, vector<8x128xf32>
    %c0_35 = arith.constant 0 : index
    %c5 = arith.constant 5 : index
    %c0_36 = arith.constant 0 : index
    %c0_37 = arith.constant 0 : index
    %60 = vector.load %arg2[%c0_35, %c5, %c0_36, %c0_37] : memref<1x10x8x128xf32, #tpu.memory_space<vmem>>, vector<1x1x8x128xf32>
    %61 = vector.shape_cast %60 : vector<1x1x8x128xf32> to vector<8x128xf32>
    %62 = vector.extract_strided_slice %9 {offsets = [1, 0, 0], sizes = [1, 1, 128], strides = [1, 1, 1]} : vector<2x1x128xf32> to vector<1x1x128xf32>
    %63 = vector.shape_cast %62 : vector<1x1x128xf32> to vector<1x128xf32>
    %c7_i32_38 = arith.constant 7 : i32
    %64 = tpu.dynamic_rotate %61 by %c7_i32_38 dim 0 : vector<8x128xf32>, i32 -> vector<8x128xf32>
    %c7_i32_39 = arith.constant 7 : i32
    %65 = vector.broadcast %c7_i32_39 : i32 to vector<8x1xi32>
    %66 = arith.cmpi eq, %11, %65 : vector<8x1xi32>
    %67 = vector.shape_cast %66 : vector<8x1xi1> to vector<8x1xi1>
    %68 = vector.broadcast %67 : vector<8x1xi1> to vector<8x128xi1>
    %69 = vector.shape_cast %63 : vector<1x128xf32> to vector<1x128xf32>
    %70 = vector.broadcast %69 : vector<1x128xf32> to vector<8x128xf32>
    %71 = arith.select %68, %70, %64 : vector<8x128xi1>, vector<8x128xf32>
    %c0_40 = arith.constant 0 : index
    %c6 = arith.constant 6 : index
    %c0_41 = arith.constant 0 : index
    %c0_42 = arith.constant 0 : index
    %72 = vector.load %arg2[%c0_40, %c6, %c0_41, %c0_42] : memref<1x10x8x128xf32, #tpu.memory_space<vmem>>, vector<1x1x8x128xf32>
    %73 = vector.shape_cast %72 : vector<1x1x8x128xf32> to vector<8x128xf32>
    %74 = vector.extract_strided_slice %6 {offsets = [0, 0, 0], sizes = [1, 1, 128], strides = [1, 1, 1]} : vector<2x1x128xf32> to vector<1x1x128xf32>
    %75 = vector.shape_cast %74 : vector<1x1x128xf32> to vector<1x128xf32>
    %c1_i32_43 = arith.constant 1 : i32
    %76 = tpu.dynamic_rotate %73 by %c1_i32_43 dim 0 : vector<8x128xf32>, i32 -> vector<8x128xf32>
    %c0_i32_44 = arith.constant 0 : i32
    %77 = vector.broadcast %c0_i32_44 : i32 to vector<8x1xi32>
    %78 = arith.cmpi eq, %11, %77 : vector<8x1xi32>
    %79 = vector.shape_cast %78 : vector<8x1xi1> to vector<8x1xi1>
    %80 = vector.broadcast %79 : vector<8x1xi1> to vector<8x128xi1>
    %81 = vector.shape_cast %75 : vector<1x128xf32> to vector<1x128xf32>
    %82 = vector.broadcast %81 : vector<1x128xf32> to vector<8x128xf32>
    %83 = arith.select %80, %82, %76 : vector<8x128xi1>, vector<8x128xf32>
    %c0_45 = arith.constant 0 : index
    %c7_46 = arith.constant 7 : index
    %c0_47 = arith.constant 0 : index
    %c0_48 = arith.constant 0 : index
    %84 = vector.load %arg2[%c0_45, %c7_46, %c0_47, %c0_48] : memref<1x10x8x128xf32, #tpu.memory_space<vmem>>, vector<1x1x8x128xf32>
    %85 = vector.shape_cast %84 : vector<1x1x8x128xf32> to vector<8x128xf32>
    %86 = vector.extract_strided_slice %6 {offsets = [1, 0, 0], sizes = [1, 1, 128], strides = [1, 1, 1]} : vector<2x1x128xf32> to vector<1x1x128xf32>
    %87 = vector.shape_cast %86 : vector<1x1x128xf32> to vector<1x128xf32>
    %c1_i32_49 = arith.constant 1 : i32
    %88 = tpu.dynamic_rotate %85 by %c1_i32_49 dim 0 : vector<8x128xf32>, i32 -> vector<8x128xf32>
    %c0_i32_50 = arith.constant 0 : i32
    %89 = vector.broadcast %c0_i32_50 : i32 to vector<8x1xi32>
    %90 = arith.cmpi eq, %11, %89 : vector<8x1xi32>
    %91 = vector.shape_cast %90 : vector<8x1xi1> to vector<8x1xi1>
    %92 = vector.broadcast %91 : vector<8x1xi1> to vector<8x128xi1>
    %93 = vector.shape_cast %87 : vector<1x128xf32> to vector<1x128xf32>
    %94 = vector.broadcast %93 : vector<1x128xf32> to vector<8x128xf32>
    %95 = arith.select %92, %94, %88 : vector<8x128xi1>, vector<8x128xf32>
    %c0_51 = arith.constant 0 : index
    %c8 = arith.constant 8 : index
    %c0_52 = arith.constant 0 : index
    %c0_53 = arith.constant 0 : index
    %96 = vector.load %arg2[%c0_51, %c8, %c0_52, %c0_53] : memref<1x10x8x128xf32, #tpu.memory_space<vmem>>, vector<1x1x8x128xf32>
    %97 = vector.shape_cast %96 : vector<1x1x8x128xf32> to vector<8x128xf32>
    %c0_54 = arith.constant 0 : index
    %c9 = arith.constant 9 : index
    %c0_55 = arith.constant 0 : index
    %c0_56 = arith.constant 0 : index
    %98 = vector.load %arg2[%c0_54, %c9, %c0_55, %c0_56] : memref<1x10x8x128xf32, #tpu.memory_space<vmem>>, vector<1x1x8x128xf32>
    %99 = vector.shape_cast %98 : vector<1x1x8x128xf32> to vector<8x128xf32>
    %c0_57 = arith.constant 0 : index
    %c0_58 = arith.constant 0 : index
    %100 = memref.load %arg5[%c0_57, %c0_58] : memref<8x10xf32, #tpu.memory_space<smem>>
    %101 = vector.broadcast %100 : f32 to vector<8x128xf32>
    %102 = arith.mulf %101, %20 : vector<8x128xf32>
    %c0_59 = arith.constant 0 : index
    %103 = memref.load %arg6[%c0_59] : memref<8xf32, #tpu.memory_space<smem>>
    %104 = vector.broadcast %103 : f32 to vector<8x128xf32>
    %105 = arith.addf %102, %104 : vector<8x128xf32>
    %c1_60 = arith.constant 1 : index
    %c0_61 = arith.constant 0 : index
    %106 = memref.load %arg5[%c1_60, %c0_61] : memref<8x10xf32, #tpu.memory_space<smem>>
    %107 = vector.broadcast %106 : f32 to vector<8x128xf32>
    %108 = arith.mulf %107, %20 : vector<8x128xf32>
    %c1_62 = arith.constant 1 : index
    %109 = memref.load %arg6[%c1_62] : memref<8xf32, #tpu.memory_space<smem>>
    %110 = vector.broadcast %109 : f32 to vector<8x128xf32>
    %111 = arith.addf %108, %110 : vector<8x128xf32>
    %c2_63 = arith.constant 2 : index
    %c0_64 = arith.constant 0 : index
    %112 = memref.load %arg5[%c2_63, %c0_64] : memref<8x10xf32, #tpu.memory_space<smem>>
    %113 = vector.broadcast %112 : f32 to vector<8x128xf32>
    %114 = arith.mulf %113, %20 : vector<8x128xf32>
    %c2_65 = arith.constant 2 : index
    %115 = memref.load %arg6[%c2_65] : memref<8xf32, #tpu.memory_space<smem>>
    %116 = vector.broadcast %115 : f32 to vector<8x128xf32>
    %117 = arith.addf %114, %116 : vector<8x128xf32>
    %c3_66 = arith.constant 3 : index
    %c0_67 = arith.constant 0 : index
    %118 = memref.load %arg5[%c3_66, %c0_67] : memref<8x10xf32, #tpu.memory_space<smem>>
    %119 = vector.broadcast %118 : f32 to vector<8x128xf32>
    %120 = arith.mulf %119, %20 : vector<8x128xf32>
    %c3_68 = arith.constant 3 : index
    %121 = memref.load %arg6[%c3_68] : memref<8xf32, #tpu.memory_space<smem>>
    %122 = vector.broadcast %121 : f32 to vector<8x128xf32>
    %123 = arith.addf %120, %122 : vector<8x128xf32>
    %c0_69 = arith.constant 0 : index
    %c1_70 = arith.constant 1 : index
    %124 = memref.load %arg5[%c0_69, %c1_70] : memref<8x10xf32, #tpu.memory_space<smem>>
    %125 = vector.broadcast %124 : f32 to vector<8x128xf32>
    %126 = arith.mulf %125, %29 : vector<8x128xf32>
    %127 = arith.addf %105, %126 : vector<8x128xf32>
    %c1_71 = arith.constant 1 : index
    %c1_72 = arith.constant 1 : index
    %128 = memref.load %arg5[%c1_71, %c1_72] : memref<8x10xf32, #tpu.memory_space<smem>>
    %129 = vector.broadcast %128 : f32 to vector<8x128xf32>
    %130 = arith.mulf %129, %29 : vector<8x128xf32>
    %131 = arith.addf %111, %130 : vector<8x128xf32>
    %c2_73 = arith.constant 2 : index
    %c1_74 = arith.constant 1 : index
    %132 = memref.load %arg5[%c2_73, %c1_74] : memref<8x10xf32, #tpu.memory_space<smem>>
    %133 = vector.broadcast %132 : f32 to vector<8x128xf32>
    %134 = arith.mulf %133, %29 : vector<8x128xf32>
    %135 = arith.addf %117, %134 : vector<8x128xf32>
    %c3_75 = arith.constant 3 : index
    %c1_76 = arith.constant 1 : index
    %136 = memref.load %arg5[%c3_75, %c1_76] : memref<8x10xf32, #tpu.memory_space<smem>>
    %137 = vector.broadcast %136 : f32 to vector<8x128xf32>
    %138 = arith.mulf %137, %29 : vector<8x128xf32>
    %139 = arith.addf %123, %138 : vector<8x128xf32>
    %c0_77 = arith.constant 0 : index
    %c2_78 = arith.constant 2 : index
    %140 = memref.load %arg5[%c0_77, %c2_78] : memref<8x10xf32, #tpu.memory_space<smem>>
    %141 = vector.broadcast %140 : f32 to vector<8x128xf32>
    %142 = arith.mulf %141, %38 : vector<8x128xf32>
    %143 = arith.addf %127, %142 : vector<8x128xf32>
    %c1_79 = arith.constant 1 : index
    %c2_80 = arith.constant 2 : index
    %144 = memref.load %arg5[%c1_79, %c2_80] : memref<8x10xf32, #tpu.memory_space<smem>>
    %145 = vector.broadcast %144 : f32 to vector<8x128xf32>
    %146 = arith.mulf %145, %38 : vector<8x128xf32>
    %147 = arith.addf %131, %146 : vector<8x128xf32>
    %c2_81 = arith.constant 2 : index
    %c2_82 = arith.constant 2 : index
    %148 = memref.load %arg5[%c2_81, %c2_82] : memref<8x10xf32, #tpu.memory_space<smem>>
    %149 = vector.broadcast %148 : f32 to vector<8x128xf32>
    %150 = arith.mulf %149, %38 : vector<8x128xf32>
    %151 = arith.addf %135, %150 : vector<8x128xf32>
    %c3_83 = arith.constant 3 : index
    %c2_84 = arith.constant 2 : index
    %152 = memref.load %arg5[%c3_83, %c2_84] : memref<8x10xf32, #tpu.memory_space<smem>>
    %153 = vector.broadcast %152 : f32 to vector<8x128xf32>
    %154 = arith.mulf %153, %38 : vector<8x128xf32>
    %155 = arith.addf %139, %154 : vector<8x128xf32>
    %c0_85 = arith.constant 0 : index
    %c3_86 = arith.constant 3 : index
    %156 = memref.load %arg5[%c0_85, %c3_86] : memref<8x10xf32, #tpu.memory_space<smem>>
    %157 = vector.broadcast %156 : f32 to vector<8x128xf32>
    %158 = arith.mulf %157, %47 : vector<8x128xf32>
    %159 = arith.addf %143, %158 : vector<8x128xf32>
    %c1_87 = arith.constant 1 : index
    %c3_88 = arith.constant 3 : index
    %160 = memref.load %arg5[%c1_87, %c3_88] : memref<8x10xf32, #tpu.memory_space<smem>>
    %161 = vector.broadcast %160 : f32 to vector<8x128xf32>
    %162 = arith.mulf %161, %47 : vector<8x128xf32>
    %163 = arith.addf %147, %162 : vector<8x128xf32>
    %c2_89 = arith.constant 2 : index
    %c3_90 = arith.constant 3 : index
    %164 = memref.load %arg5[%c2_89, %c3_90] : memref<8x10xf32, #tpu.memory_space<smem>>
    %165 = vector.broadcast %164 : f32 to vector<8x128xf32>
    %166 = arith.mulf %165, %47 : vector<8x128xf32>
    %167 = arith.addf %151, %166 : vector<8x128xf32>
    %c3_91 = arith.constant 3 : index
    %c3_92 = arith.constant 3 : index
    %168 = memref.load %arg5[%c3_91, %c3_92] : memref<8x10xf32, #tpu.memory_space<smem>>
    %169 = vector.broadcast %168 : f32 to vector<8x128xf32>
    %170 = arith.mulf %169, %47 : vector<8x128xf32>
    %171 = arith.addf %155, %170 : vector<8x128xf32>
    %c0_93 = arith.constant 0 : index
    %c4_94 = arith.constant 4 : index
    %172 = memref.load %arg5[%c0_93, %c4_94] : memref<8x10xf32, #tpu.memory_space<smem>>
    %173 = vector.broadcast %172 : f32 to vector<8x128xf32>
    %174 = arith.mulf %173, %59 : vector<8x128xf32>
    %175 = arith.addf %159, %174 : vector<8x128xf32>
    %c1_95 = arith.constant 1 : index
    %c4_96 = arith.constant 4 : index
    %176 = memref.load %arg5[%c1_95, %c4_96] : memref<8x10xf32, #tpu.memory_space<smem>>
    %177 = vector.broadcast %176 : f32 to vector<8x128xf32>
    %178 = arith.mulf %177, %59 : vector<8x128xf32>
    %179 = arith.addf %163, %178 : vector<8x128xf32>
    %c2_97 = arith.constant 2 : index
    %c4_98 = arith.constant 4 : index
    %180 = memref.load %arg5[%c2_97, %c4_98] : memref<8x10xf32, #tpu.memory_space<smem>>
    %181 = vector.broadcast %180 : f32 to vector<8x128xf32>
    %182 = arith.mulf %181, %59 : vector<8x128xf32>
    %183 = arith.addf %167, %182 : vector<8x128xf32>
    %c3_99 = arith.constant 3 : index
    %c4_100 = arith.constant 4 : index
    %184 = memref.load %arg5[%c3_99, %c4_100] : memref<8x10xf32, #tpu.memory_space<smem>>
    %185 = vector.broadcast %184 : f32 to vector<8x128xf32>
    %186 = arith.mulf %185, %59 : vector<8x128xf32>
    %187 = arith.addf %171, %186 : vector<8x128xf32>
    %c0_101 = arith.constant 0 : index
    %c5_102 = arith.constant 5 : index
    %188 = memref.load %arg5[%c0_101, %c5_102] : memref<8x10xf32, #tpu.memory_space<smem>>
    %189 = vector.broadcast %188 : f32 to vector<8x128xf32>
    %190 = arith.mulf %189, %71 : vector<8x128xf32>
    %191 = arith.addf %175, %190 : vector<8x128xf32>
    %c1_103 = arith.constant 1 : index
    %c5_104 = arith.constant 5 : index
    %192 = memref.load %arg5[%c1_103, %c5_104] : memref<8x10xf32, #tpu.memory_space<smem>>
    %193 = vector.broadcast %192 : f32 to vector<8x128xf32>
    %194 = arith.mulf %193, %71 : vector<8x128xf32>
    %195 = arith.addf %179, %194 : vector<8x128xf32>
    %c2_105 = arith.constant 2 : index
    %c5_106 = arith.constant 5 : index
    %196 = memref.load %arg5[%c2_105, %c5_106] : memref<8x10xf32, #tpu.memory_space<smem>>
    %197 = vector.broadcast %196 : f32 to vector<8x128xf32>
    %198 = arith.mulf %197, %71 : vector<8x128xf32>
    %199 = arith.addf %183, %198 : vector<8x128xf32>
    %c3_107 = arith.constant 3 : index
    %c5_108 = arith.constant 5 : index
    %200 = memref.load %arg5[%c3_107, %c5_108] : memref<8x10xf32, #tpu.memory_space<smem>>
    %201 = vector.broadcast %200 : f32 to vector<8x128xf32>
    %202 = arith.mulf %201, %71 : vector<8x128xf32>
    %203 = arith.addf %187, %202 : vector<8x128xf32>
    %c0_109 = arith.constant 0 : index
    %c6_110 = arith.constant 6 : index
    %204 = memref.load %arg5[%c0_109, %c6_110] : memref<8x10xf32, #tpu.memory_space<smem>>
    %205 = vector.broadcast %204 : f32 to vector<8x128xf32>
    %206 = arith.mulf %205, %83 : vector<8x128xf32>
    %207 = arith.addf %191, %206 : vector<8x128xf32>
    %c1_111 = arith.constant 1 : index
    %c6_112 = arith.constant 6 : index
    %208 = memref.load %arg5[%c1_111, %c6_112] : memref<8x10xf32, #tpu.memory_space<smem>>
    %209 = vector.broadcast %208 : f32 to vector<8x128xf32>
    %210 = arith.mulf %209, %83 : vector<8x128xf32>
    %211 = arith.addf %195, %210 : vector<8x128xf32>
    %c2_113 = arith.constant 2 : index
    %c6_114 = arith.constant 6 : index
    %212 = memref.load %arg5[%c2_113, %c6_114] : memref<8x10xf32, #tpu.memory_space<smem>>
    %213 = vector.broadcast %212 : f32 to vector<8x128xf32>
    %214 = arith.mulf %213, %83 : vector<8x128xf32>
    %215 = arith.addf %199, %214 : vector<8x128xf32>
    %c3_115 = arith.constant 3 : index
    %c6_116 = arith.constant 6 : index
    %216 = memref.load %arg5[%c3_115, %c6_116] : memref<8x10xf32, #tpu.memory_space<smem>>
    %217 = vector.broadcast %216 : f32 to vector<8x128xf32>
    %218 = arith.mulf %217, %83 : vector<8x128xf32>
    %219 = arith.addf %203, %218 : vector<8x128xf32>
    %c0_117 = arith.constant 0 : index
    %c7_118 = arith.constant 7 : index
    %220 = memref.load %arg5[%c0_117, %c7_118] : memref<8x10xf32, #tpu.memory_space<smem>>
    %221 = vector.broadcast %220 : f32 to vector<8x128xf32>
    %222 = arith.mulf %221, %95 : vector<8x128xf32>
    %223 = arith.addf %207, %222 : vector<8x128xf32>
    %c1_119 = arith.constant 1 : index
    %c7_120 = arith.constant 7 : index
    %224 = memref.load %arg5[%c1_119, %c7_120] : memref<8x10xf32, #tpu.memory_space<smem>>
    %225 = vector.broadcast %224 : f32 to vector<8x128xf32>
    %226 = arith.mulf %225, %95 : vector<8x128xf32>
    %227 = arith.addf %211, %226 : vector<8x128xf32>
    %c2_121 = arith.constant 2 : index
    %c7_122 = arith.constant 7 : index
    %228 = memref.load %arg5[%c2_121, %c7_122] : memref<8x10xf32, #tpu.memory_space<smem>>
    %229 = vector.broadcast %228 : f32 to vector<8x128xf32>
    %230 = arith.mulf %229, %95 : vector<8x128xf32>
    %231 = arith.addf %215, %230 : vector<8x128xf32>
    %c3_123 = arith.constant 3 : index
    %c7_124 = arith.constant 7 : index
    %232 = memref.load %arg5[%c3_123, %c7_124] : memref<8x10xf32, #tpu.memory_space<smem>>
    %233 = vector.broadcast %232 : f32 to vector<8x128xf32>
    %234 = arith.mulf %233, %95 : vector<8x128xf32>
    %235 = arith.addf %219, %234 : vector<8x128xf32>
    %c0_125 = arith.constant 0 : index
    %c8_126 = arith.constant 8 : index
    %236 = memref.load %arg5[%c0_125, %c8_126] : memref<8x10xf32, #tpu.memory_space<smem>>
    %237 = vector.broadcast %236 : f32 to vector<8x128xf32>
    %238 = arith.mulf %237, %97 : vector<8x128xf32>
    %239 = arith.addf %223, %238 : vector<8x128xf32>
    %c1_127 = arith.constant 1 : index
    %c8_128 = arith.constant 8 : index
    %240 = memref.load %arg5[%c1_127, %c8_128] : memref<8x10xf32, #tpu.memory_space<smem>>
    %241 = vector.broadcast %240 : f32 to vector<8x128xf32>
    %242 = arith.mulf %241, %97 : vector<8x128xf32>
    %243 = arith.addf %227, %242 : vector<8x128xf32>
    %c2_129 = arith.constant 2 : index
    %c8_130 = arith.constant 8 : index
    %244 = memref.load %arg5[%c2_129, %c8_130] : memref<8x10xf32, #tpu.memory_space<smem>>
    %245 = vector.broadcast %244 : f32 to vector<8x128xf32>
    %246 = arith.mulf %245, %97 : vector<8x128xf32>
    %247 = arith.addf %231, %246 : vector<8x128xf32>
    %c3_131 = arith.constant 3 : index
    %c8_132 = arith.constant 8 : index
    %248 = memref.load %arg5[%c3_131, %c8_132] : memref<8x10xf32, #tpu.memory_space<smem>>
    %249 = vector.broadcast %248 : f32 to vector<8x128xf32>
    %250 = arith.mulf %249, %97 : vector<8x128xf32>
    %251 = arith.addf %235, %250 : vector<8x128xf32>
    %c0_133 = arith.constant 0 : index
    %c9_134 = arith.constant 9 : index
    %252 = memref.load %arg5[%c0_133, %c9_134] : memref<8x10xf32, #tpu.memory_space<smem>>
    %253 = vector.broadcast %252 : f32 to vector<8x128xf32>
    %254 = arith.mulf %253, %99 : vector<8x128xf32>
    %255 = arith.addf %239, %254 : vector<8x128xf32>
    %c1_135 = arith.constant 1 : index
    %c9_136 = arith.constant 9 : index
    %256 = memref.load %arg5[%c1_135, %c9_136] : memref<8x10xf32, #tpu.memory_space<smem>>
    %257 = vector.broadcast %256 : f32 to vector<8x128xf32>
    %258 = arith.mulf %257, %99 : vector<8x128xf32>
    %259 = arith.addf %243, %258 : vector<8x128xf32>
    %c2_137 = arith.constant 2 : index
    %c9_138 = arith.constant 9 : index
    %260 = memref.load %arg5[%c2_137, %c9_138] : memref<8x10xf32, #tpu.memory_space<smem>>
    %261 = vector.broadcast %260 : f32 to vector<8x128xf32>
    %262 = arith.mulf %261, %99 : vector<8x128xf32>
    %263 = arith.addf %247, %262 : vector<8x128xf32>
    %c3_139 = arith.constant 3 : index
    %c9_140 = arith.constant 9 : index
    %264 = memref.load %arg5[%c3_139, %c9_140] : memref<8x10xf32, #tpu.memory_space<smem>>
    %265 = vector.broadcast %264 : f32 to vector<8x128xf32>
    %266 = arith.mulf %265, %99 : vector<8x128xf32>
    %267 = arith.addf %251, %266 : vector<8x128xf32>
    %c0_141 = arith.constant 0 : index
    %c0_142 = arith.constant 0 : index
    %c0_143 = arith.constant 0 : index
    %c0_144 = arith.constant 0 : index
    %268 = vector.load %arg7[%c0_141, %c0_142, %c0_143, %c0_144] : memref<1x8x8x128xf32, #tpu.memory_space<vmem>>, vector<1x1x8x128xf32>
    %269 = vector.shape_cast %268 : vector<1x1x8x128xf32> to vector<8x128xf32>
    %270 = vector.shape_cast %255 : vector<8x128xf32> to vector<1x1x8x128xf32>
    tpu.vector_store %arg7[%c0_141, %c0_142, %c0_143, %c0_144], %270 {strides = array<i32>} : memref<1x8x8x128xf32, #tpu.memory_space<vmem>>, vector<1x1x8x128xf32>,
    %c0_145 = arith.constant 0 : index
    %c1_146 = arith.constant 1 : index
    %c0_147 = arith.constant 0 : index
    %c0_148 = arith.constant 0 : index
    %271 = vector.load %arg7[%c0_145, %c1_146, %c0_147, %c0_148] : memref<1x8x8x128xf32, #tpu.memory_space<vmem>>, vector<1x1x8x128xf32>
    %272 = vector.shape_cast %271 : vector<1x1x8x128xf32> to vector<8x128xf32>
    %273 = vector.shape_cast %259 : vector<8x128xf32> to vector<1x1x8x128xf32>
    tpu.vector_store %arg7[%c0_145, %c1_146, %c0_147, %c0_148], %273 {strides = array<i32>} : memref<1x8x8x128xf32, #tpu.memory_space<vmem>>, vector<1x1x8x128xf32>,
    %c0_149 = arith.constant 0 : index
    %c2_150 = arith.constant 2 : index
    %c0_151 = arith.constant 0 : index
    %c0_152 = arith.constant 0 : index
    %274 = vector.load %arg7[%c0_149, %c2_150, %c0_151, %c0_152] : memref<1x8x8x128xf32, #tpu.memory_space<vmem>>, vector<1x1x8x128xf32>
    %275 = vector.shape_cast %274 : vector<1x1x8x128xf32> to vector<8x128xf32>
    %276 = vector.shape_cast %263 : vector<8x128xf32> to vector<1x1x8x128xf32>
    tpu.vector_store %arg7[%c0_149, %c2_150, %c0_151, %c0_152], %276 {strides = array<i32>} : memref<1x8x8x128xf32, #tpu.memory_space<vmem>>, vector<1x1x8x128xf32>,
    %c0_153 = arith.constant 0 : index
    %c3_154 = arith.constant 3 : index
    %c0_155 = arith.constant 0 : index
    %c0_156 = arith.constant 0 : index
    %277 = vector.load %arg7[%c0_153, %c3_154, %c0_155, %c0_156] : memref<1x8x8x128xf32, #tpu.memory_space<vmem>>, vector<1x1x8x128xf32>
    %278 = vector.shape_cast %277 : vector<1x1x8x128xf32> to vector<8x128xf32>
    %279 = vector.shape_cast %267 : vector<8x128xf32> to vector<1x1x8x128xf32>
    tpu.vector_store %arg7[%c0_153, %c3_154, %c0_155, %c0_156], %279 {strides = array<i32>} : memref<1x8x8x128xf32, #tpu.memory_space<vmem>>, vector<1x1x8x128xf32>,
    %c4_157 = arith.constant 4 : index
    %c0_158 = arith.constant 0 : index
    %280 = memref.load %arg5[%c4_157, %c0_158] : memref<8x10xf32, #tpu.memory_space<smem>>
    %281 = vector.broadcast %280 : f32 to vector<8x128xf32>
    %282 = arith.mulf %281, %20 : vector<8x128xf32>
    %c4_159 = arith.constant 4 : index
    %283 = memref.load %arg6[%c4_159] : memref<8xf32, #tpu.memory_space<smem>>
    %284 = vector.broadcast %283 : f32 to vector<8x128xf32>
    %285 = arith.addf %282, %284 : vector<8x128xf32>
    %c5_160 = arith.constant 5 : index
    %c0_161 = arith.constant 0 : index
    %286 = memref.load %arg5[%c5_160, %c0_161] : memref<8x10xf32, #tpu.memory_space<smem>>
    %287 = vector.broadcast %286 : f32 to vector<8x128xf32>
    %288 = arith.mulf %287, %20 : vector<8x128xf32>
    %c5_162 = arith.constant 5 : index
    %289 = memref.load %arg6[%c5_162] : memref<8xf32, #tpu.memory_space<smem>>
    %290 = vector.broadcast %289 : f32 to vector<8x128xf32>
    %291 = arith.addf %288, %290 : vector<8x128xf32>
    %c6_163 = arith.constant 6 : index
    %c0_164 = arith.constant 0 : index
    %292 = memref.load %arg5[%c6_163, %c0_164] : memref<8x10xf32, #tpu.memory_space<smem>>
    %293 = vector.broadcast %292 : f32 to vector<8x128xf32>
    %294 = arith.mulf %293, %20 : vector<8x128xf32>
    %c6_165 = arith.constant 6 : index
    %295 = memref.load %arg6[%c6_165] : memref<8xf32, #tpu.memory_space<smem>>
    %296 = vector.broadcast %295 : f32 to vector<8x128xf32>
    %297 = arith.addf %294, %296 : vector<8x128xf32>
    %c7_166 = arith.constant 7 : index
    %c0_167 = arith.constant 0 : index
    %298 = memref.load %arg5[%c7_166, %c0_167] : memref<8x10xf32, #tpu.memory_space<smem>>
    %299 = vector.broadcast %298 : f32 to vector<8x128xf32>
    %300 = arith.mulf %299, %20 : vector<8x128xf32>
    %c7_168 = arith.constant 7 : index
    %301 = memref.load %arg6[%c7_168] : memref<8xf32, #tpu.memory_space<smem>>
    %302 = vector.broadcast %301 : f32 to vector<8x128xf32>
    %303 = arith.addf %300, %302 : vector<8x128xf32>
    %c4_169 = arith.constant 4 : index
    %c1_170 = arith.constant 1 : index
    %304 = memref.load %arg5[%c4_169, %c1_170] : memref<8x10xf32, #tpu.memory_space<smem>>
    %305 = vector.broadcast %304 : f32 to vector<8x128xf32>
    %306 = arith.mulf %305, %29 : vector<8x128xf32>
    %307 = arith.addf %285, %306 : vector<8x128xf32>
    %c5_171 = arith.constant 5 : index
    %c1_172 = arith.constant 1 : index
    %308 = memref.load %arg5[%c5_171, %c1_172] : memref<8x10xf32, #tpu.memory_space<smem>>
    %309 = vector.broadcast %308 : f32 to vector<8x128xf32>
    %310 = arith.mulf %309, %29 : vector<8x128xf32>
    %311 = arith.addf %291, %310 : vector<8x128xf32>
    %c6_173 = arith.constant 6 : index
    %c1_174 = arith.constant 1 : index
    %312 = memref.load %arg5[%c6_173, %c1_174] : memref<8x10xf32, #tpu.memory_space<smem>>
    %313 = vector.broadcast %312 : f32 to vector<8x128xf32>
    %314 = arith.mulf %313, %29 : vector<8x128xf32>
    %315 = arith.addf %297, %314 : vector<8x128xf32>
    %c7_175 = arith.constant 7 : index
    %c1_176 = arith.constant 1 : index
    %316 = memref.load %arg5[%c7_175, %c1_176] : memref<8x10xf32, #tpu.memory_space<smem>>
    %317 = vector.broadcast %316 : f32 to vector<8x128xf32>
    %318 = arith.mulf %317, %29 : vector<8x128xf32>
    %319 = arith.addf %303, %318 : vector<8x128xf32>
    %c4_177 = arith.constant 4 : index
    %c2_178 = arith.constant 2 : index
    %320 = memref.load %arg5[%c4_177, %c2_178] : memref<8x10xf32, #tpu.memory_space<smem>>
    %321 = vector.broadcast %320 : f32 to vector<8x128xf32>
    %322 = arith.mulf %321, %38 : vector<8x128xf32>
    %323 = arith.addf %307, %322 : vector<8x128xf32>
    %c5_179 = arith.constant 5 : index
    %c2_180 = arith.constant 2 : index
    %324 = memref.load %arg5[%c5_179, %c2_180] : memref<8x10xf32, #tpu.memory_space<smem>>
    %325 = vector.broadcast %324 : f32 to vector<8x128xf32>
    %326 = arith.mulf %325, %38 : vector<8x128xf32>
    %327 = arith.addf %311, %326 : vector<8x128xf32>
    %c6_181 = arith.constant 6 : index
    %c2_182 = arith.constant 2 : index
    %328 = memref.load %arg5[%c6_181, %c2_182] : memref<8x10xf32, #tpu.memory_space<smem>>
    %329 = vector.broadcast %328 : f32 to vector<8x128xf32>
    %330 = arith.mulf %329, %38 : vector<8x128xf32>
    %331 = arith.addf %315, %330 : vector<8x128xf32>
    %c7_183 = arith.constant 7 : index
    %c2_184 = arith.constant 2 : index
    %332 = memref.load %arg5[%c7_183, %c2_184] : memref<8x10xf32, #tpu.memory_space<smem>>
    %333 = vector.broadcast %332 : f32 to vector<8x128xf32>
    %334 = arith.mulf %333, %38 : vector<8x128xf32>
    %335 = arith.addf %319, %334 : vector<8x128xf32>
    %c4_185 = arith.constant 4 : index
    %c3_186 = arith.constant 3 : index
    %336 = memref.load %arg5[%c4_185, %c3_186] : memref<8x10xf32, #tpu.memory_space<smem>>
    %337 = vector.broadcast %336 : f32 to vector<8x128xf32>
    %338 = arith.mulf %337, %47 : vector<8x128xf32>
    %339 = arith.addf %323, %338 : vector<8x128xf32>
    %c5_187 = arith.constant 5 : index
    %c3_188 = arith.constant 3 : index
    %340 = memref.load %arg5[%c5_187, %c3_188] : memref<8x10xf32, #tpu.memory_space<smem>>
    %341 = vector.broadcast %340 : f32 to vector<8x128xf32>
    %342 = arith.mulf %341, %47 : vector<8x128xf32>
    %343 = arith.addf %327, %342 : vector<8x128xf32>
    %c6_189 = arith.constant 6 : index
    %c3_190 = arith.constant 3 : index
    %344 = memref.load %arg5[%c6_189, %c3_190] : memref<8x10xf32, #tpu.memory_space<smem>>
    %345 = vector.broadcast %344 : f32 to vector<8x128xf32>
    %346 = arith.mulf %345, %47 : vector<8x128xf32>
    %347 = arith.addf %331, %346 : vector<8x128xf32>
    %c7_191 = arith.constant 7 : index
    %c3_192 = arith.constant 3 : index
    %348 = memref.load %arg5[%c7_191, %c3_192] : memref<8x10xf32, #tpu.memory_space<smem>>
    %349 = vector.broadcast %348 : f32 to vector<8x128xf32>
    %350 = arith.mulf %349, %47 : vector<8x128xf32>
    %351 = arith.addf %335, %350 : vector<8x128xf32>
    %c4_193 = arith.constant 4 : index
    %c4_194 = arith.constant 4 : index
    %352 = memref.load %arg5[%c4_193, %c4_194] : memref<8x10xf32, #tpu.memory_space<smem>>
    %353 = vector.broadcast %352 : f32 to vector<8x128xf32>
    %354 = arith.mulf %353, %59 : vector<8x128xf32>
    %355 = arith.addf %339, %354 : vector<8x128xf32>
    %c5_195 = arith.constant 5 : index
    %c4_196 = arith.constant 4 : index
    %356 = memref.load %arg5[%c5_195, %c4_196] : memref<8x10xf32, #tpu.memory_space<smem>>
    %357 = vector.broadcast %356 : f32 to vector<8x128xf32>
    %358 = arith.mulf %357, %59 : vector<8x128xf32>
    %359 = arith.addf %343, %358 : vector<8x128xf32>
    %c6_197 = arith.constant 6 : index
    %c4_198 = arith.constant 4 : index
    %360 = memref.load %arg5[%c6_197, %c4_198] : memref<8x10xf32, #tpu.memory_space<smem>>
    %361 = vector.broadcast %360 : f32 to vector<8x128xf32>
    %362 = arith.mulf %361, %59 : vector<8x128xf32>
    %363 = arith.addf %347, %362 : vector<8x128xf32>
    %c7_199 = arith.constant 7 : index
    %c4_200 = arith.constant 4 : index
    %364 = memref.load %arg5[%c7_199, %c4_200] : memref<8x10xf32, #tpu.memory_space<smem>>
    %365 = vector.broadcast %364 : f32 to vector<8x128xf32>
    %366 = arith.mulf %365, %59 : vector<8x128xf32>
    %367 = arith.addf %351, %366 : vector<8x128xf32>
    %c4_201 = arith.constant 4 : index
    %c5_202 = arith.constant 5 : index
    %368 = memref.load %arg5[%c4_201, %c5_202] : memref<8x10xf32, #tpu.memory_space<smem>>
    %369 = vector.broadcast %368 : f32 to vector<8x128xf32>
    %370 = arith.mulf %369, %71 : vector<8x128xf32>
    %371 = arith.addf %355, %370 : vector<8x128xf32>
    %c5_203 = arith.constant 5 : index
    %c5_204 = arith.constant 5 : index
    %372 = memref.load %arg5[%c5_203, %c5_204] : memref<8x10xf32, #tpu.memory_space<smem>>
    %373 = vector.broadcast %372 : f32 to vector<8x128xf32>
    %374 = arith.mulf %373, %71 : vector<8x128xf32>
    %375 = arith.addf %359, %374 : vector<8x128xf32>
    %c6_205 = arith.constant 6 : index
    %c5_206 = arith.constant 5 : index
    %376 = memref.load %arg5[%c6_205, %c5_206] : memref<8x10xf32, #tpu.memory_space<smem>>
    %377 = vector.broadcast %376 : f32 to vector<8x128xf32>
    %378 = arith.mulf %377, %71 : vector<8x128xf32>
    %379 = arith.addf %363, %378 : vector<8x128xf32>
    %c7_207 = arith.constant 7 : index
    %c5_208 = arith.constant 5 : index
    %380 = memref.load %arg5[%c7_207, %c5_208] : memref<8x10xf32, #tpu.memory_space<smem>>
    %381 = vector.broadcast %380 : f32 to vector<8x128xf32>
    %382 = arith.mulf %381, %71 : vector<8x128xf32>
    %383 = arith.addf %367, %382 : vector<8x128xf32>
    %c4_209 = arith.constant 4 : index
    %c6_210 = arith.constant 6 : index
    %384 = memref.load %arg5[%c4_209, %c6_210] : memref<8x10xf32, #tpu.memory_space<smem>>
    %385 = vector.broadcast %384 : f32 to vector<8x128xf32>
    %386 = arith.mulf %385, %83 : vector<8x128xf32>
    %387 = arith.addf %371, %386 : vector<8x128xf32>
    %c5_211 = arith.constant 5 : index
    %c6_212 = arith.constant 6 : index
    %388 = memref.load %arg5[%c5_211, %c6_212] : memref<8x10xf32, #tpu.memory_space<smem>>
    %389 = vector.broadcast %388 : f32 to vector<8x128xf32>
    %390 = arith.mulf %389, %83 : vector<8x128xf32>
    %391 = arith.addf %375, %390 : vector<8x128xf32>
    %c6_213 = arith.constant 6 : index
    %c6_214 = arith.constant 6 : index
    %392 = memref.load %arg5[%c6_213, %c6_214] : memref<8x10xf32, #tpu.memory_space<smem>>
    %393 = vector.broadcast %392 : f32 to vector<8x128xf32>
    %394 = arith.mulf %393, %83 : vector<8x128xf32>
    %395 = arith.addf %379, %394 : vector<8x128xf32>
    %c7_215 = arith.constant 7 : index
    %c6_216 = arith.constant 6 : index
    %396 = memref.load %arg5[%c7_215, %c6_216] : memref<8x10xf32, #tpu.memory_space<smem>>
    %397 = vector.broadcast %396 : f32 to vector<8x128xf32>
    %398 = arith.mulf %397, %83 : vector<8x128xf32>
    %399 = arith.addf %383, %398 : vector<8x128xf32>
    %c4_217 = arith.constant 4 : index
    %c7_218 = arith.constant 7 : index
    %400 = memref.load %arg5[%c4_217, %c7_218] : memref<8x10xf32, #tpu.memory_space<smem>>
    %401 = vector.broadcast %400 : f32 to vector<8x128xf32>
    %402 = arith.mulf %401, %95 : vector<8x128xf32>
    %403 = arith.addf %387, %402 : vector<8x128xf32>
    %c5_219 = arith.constant 5 : index
    %c7_220 = arith.constant 7 : index
    %404 = memref.load %arg5[%c5_219, %c7_220] : memref<8x10xf32, #tpu.memory_space<smem>>
    %405 = vector.broadcast %404 : f32 to vector<8x128xf32>
    %406 = arith.mulf %405, %95 : vector<8x128xf32>
    %407 = arith.addf %391, %406 : vector<8x128xf32>
    %c6_221 = arith.constant 6 : index
    %c7_222 = arith.constant 7 : index
    %408 = memref.load %arg5[%c6_221, %c7_222] : memref<8x10xf32, #tpu.memory_space<smem>>
    %409 = vector.broadcast %408 : f32 to vector<8x128xf32>
    %410 = arith.mulf %409, %95 : vector<8x128xf32>
    %411 = arith.addf %395, %410 : vector<8x128xf32>
    %c7_223 = arith.constant 7 : index
    %c7_224 = arith.constant 7 : index
    %412 = memref.load %arg5[%c7_223, %c7_224] : memref<8x10xf32, #tpu.memory_space<smem>>
    %413 = vector.broadcast %412 : f32 to vector<8x128xf32>
    %414 = arith.mulf %413, %95 : vector<8x128xf32>
    %415 = arith.addf %399, %414 : vector<8x128xf32>
    %c4_225 = arith.constant 4 : index
    %c8_226 = arith.constant 8 : index
    %416 = memref.load %arg5[%c4_225, %c8_226] : memref<8x10xf32, #tpu.memory_space<smem>>
    %417 = vector.broadcast %416 : f32 to vector<8x128xf32>
    %418 = arith.mulf %417, %97 : vector<8x128xf32>
    %419 = arith.addf %403, %418 : vector<8x128xf32>
    %c5_227 = arith.constant 5 : index
    %c8_228 = arith.constant 8 : index
    %420 = memref.load %arg5[%c5_227, %c8_228] : memref<8x10xf32, #tpu.memory_space<smem>>
    %421 = vector.broadcast %420 : f32 to vector<8x128xf32>
    %422 = arith.mulf %421, %97 : vector<8x128xf32>
    %423 = arith.addf %407, %422 : vector<8x128xf32>
    %c6_229 = arith.constant 6 : index
    %c8_230 = arith.constant 8 : index
    %424 = memref.load %arg5[%c6_229, %c8_230] : memref<8x10xf32, #tpu.memory_space<smem>>
    %425 = vector.broadcast %424 : f32 to vector<8x128xf32>
    %426 = arith.mulf %425, %97 : vector<8x128xf32>
    %427 = arith.addf %411, %426 : vector<8x128xf32>
    %c7_231 = arith.constant 7 : index
    %c8_232 = arith.constant 8 : index
    %428 = memref.load %arg5[%c7_231, %c8_232] : memref<8x10xf32, #tpu.memory_space<smem>>
    %429 = vector.broadcast %428 : f32 to vector<8x128xf32>
    %430 = arith.mulf %429, %97 : vector<8x128xf32>
    %431 = arith.addf %415, %430 : vector<8x128xf32>
    %c4_233 = arith.constant 4 : index
    %c9_234 = arith.constant 9 : index
    %432 = memref.load %arg5[%c4_233, %c9_234] : memref<8x10xf32, #tpu.memory_space<smem>>
    %433 = vector.broadcast %432 : f32 to vector<8x128xf32>
    %434 = arith.mulf %433, %99 : vector<8x128xf32>
    %435 = arith.addf %419, %434 : vector<8x128xf32>
    %c5_235 = arith.constant 5 : index
    %c9_236 = arith.constant 9 : index
    %436 = memref.load %arg5[%c5_235, %c9_236] : memref<8x10xf32, #tpu.memory_space<smem>>
    %437 = vector.broadcast %436 : f32 to vector<8x128xf32>
    %438 = arith.mulf %437, %99 : vector<8x128xf32>
    %439 = arith.addf %423, %438 : vector<8x128xf32>
    %c6_237 = arith.constant 6 : index
    %c9_238 = arith.constant 9 : index
    %440 = memref.load %arg5[%c6_237, %c9_238] : memref<8x10xf32, #tpu.memory_space<smem>>
    %441 = vector.broadcast %440 : f32 to vector<8x128xf32>
    %442 = arith.mulf %441, %99 : vector<8x128xf32>
    %443 = arith.addf %427, %442 : vector<8x128xf32>
    %c7_239 = arith.constant 7 : index
    %c9_240 = arith.constant 9 : index
    %444 = memref.load %arg5[%c7_239, %c9_240] : memref<8x10xf32, #tpu.memory_space<smem>>
    %445 = vector.broadcast %444 : f32 to vector<8x128xf32>
    %446 = arith.mulf %445, %99 : vector<8x128xf32>
    %447 = arith.addf %431, %446 : vector<8x128xf32>
    %c0_241 = arith.constant 0 : index
    %c4_242 = arith.constant 4 : index
    %c0_243 = arith.constant 0 : index
    %c0_244 = arith.constant 0 : index
    %448 = vector.load %arg7[%c0_241, %c4_242, %c0_243, %c0_244] : memref<1x8x8x128xf32, #tpu.memory_space<vmem>>, vector<1x1x8x128xf32>
    %449 = vector.shape_cast %448 : vector<1x1x8x128xf32> to vector<8x128xf32>
    %450 = vector.shape_cast %435 : vector<8x128xf32> to vector<1x1x8x128xf32>
    tpu.vector_store %arg7[%c0_241, %c4_242, %c0_243, %c0_244], %450 {strides = array<i32>} : memref<1x8x8x128xf32, #tpu.memory_space<vmem>>, vector<1x1x8x128xf32>,
    %c0_245 = arith.constant 0 : index
    %c5_246 = arith.constant 5 : index
    %c0_247 = arith.constant 0 : index
    %c0_248 = arith.constant 0 : index
    %451 = vector.load %arg7[%c0_245, %c5_246, %c0_247, %c0_248] : memref<1x8x8x128xf32, #tpu.memory_space<vmem>>, vector<1x1x8x128xf32>
    %452 = vector.shape_cast %451 : vector<1x1x8x128xf32> to vector<8x128xf32>
    %453 = vector.shape_cast %439 : vector<8x128xf32> to vector<1x1x8x128xf32>
    tpu.vector_store %arg7[%c0_245, %c5_246, %c0_247, %c0_248], %453 {strides = array<i32>} : memref<1x8x8x128xf32, #tpu.memory_space<vmem>>, vector<1x1x8x128xf32>,
    %c0_249 = arith.constant 0 : index
    %c6_250 = arith.constant 6 : index
    %c0_251 = arith.constant 0 : index
    %c0_252 = arith.constant 0 : index
    %454 = vector.load %arg7[%c0_249, %c6_250, %c0_251, %c0_252] : memref<1x8x8x128xf32, #tpu.memory_space<vmem>>, vector<1x1x8x128xf32>
    %455 = vector.shape_cast %454 : vector<1x1x8x128xf32> to vector<8x128xf32>
    %456 = vector.shape_cast %443 : vector<8x128xf32> to vector<1x1x8x128xf32>
    tpu.vector_store %arg7[%c0_249, %c6_250, %c0_251, %c0_252], %456 {strides = array<i32>} : memref<1x8x8x128xf32, #tpu.memory_space<vmem>>, vector<1x1x8x128xf32>,
    %c0_253 = arith.constant 0 : index
    %c7_254 = arith.constant 7 : index
    %c0_255 = arith.constant 0 : index
    %c0_256 = arith.constant 0 : index
    %457 = vector.load %arg7[%c0_253, %c7_254, %c0_255, %c0_256] : memref<1x8x8x128xf32, #tpu.memory_space<vmem>>, vector<1x1x8x128xf32>
    %458 = vector.shape_cast %457 : vector<1x1x8x128xf32> to vector<8x128xf32>
    %459 = vector.shape_cast %447 : vector<8x128xf32> to vector<1x1x8x128xf32>
    tpu.vector_store %arg7[%c0_253, %c7_254, %c0_255, %c0_256], %459 {strides = array<i32>} : memref<1x8x8x128xf32, #tpu.memory_space<vmem>>, vector<1x1x8x128xf32>,
    return
  }
  func.func @transform_0(%arg0: i32, %arg1: i32) -> (i32, i32, i32, i32) {
    %c0_i32 = arith.constant 0 : i32
    %c0_i32_0 = arith.constant 0 : i32
    %c0_i32_1 = arith.constant 0 : i32
    return %arg0, %c0_i32, %arg1, %c0_i32_0 : i32, i32, i32, i32
  }
  func.func @transform_1(%arg0: i32, %arg1: i32) -> (i32, i32, i32, i32) {
    %c1_i32 = arith.constant 1 : i32
    %0 = arith.muli %arg1, %c1_i32 : i32
    %c1_i32_0 = arith.constant 1 : i32
    %1 = arith.subi %0, %c1_i32_0 : i32
    %c0_i32 = arith.constant 0 : i32
    %2 = arith.maxsi %1, %c0_i32 : i32
    %c3_i32 = arith.constant 3 : i32
    %c0_i32_1 = arith.constant 0 : i32
    %c0_i32_2 = arith.constant 0 : i32
    return %arg0, %c3_i32, %2, %c0_i32_1 : i32, i32, i32, i32
  }
  func.func @transform_2(%arg0: i32, %arg1: i32) -> (i32, i32, i32, i32) {
    %c1_i32 = arith.constant 1 : i32
    %0 = arith.addi %arg1, %c1_i32 : i32
    %c1_i32_0 = arith.constant 1 : i32
    %1 = arith.muli %0, %c1_i32_0 : i32
    %c1_i32_1 = arith.constant 1 : i32
    %2 = arith.minsi %1, %c1_i32_1 : i32
    %c2_i32 = arith.constant 2 : i32
    %c0_i32 = arith.constant 0 : i32
    %c0_i32_2 = arith.constant 0 : i32
    return %arg0, %c2_i32, %2, %c0_i32 : i32, i32, i32, i32
  }
  func.func @transform_3(%arg0: i32, %arg1: i32) -> (i32, i32) {
    %c0_i32 = arith.constant 0 : i32
    %c0_i32_0 = arith.constant 0 : i32
    %c0_i32_1 = arith.constant 0 : i32
    return %c0_i32, %c0_i32_0 : i32, i32
  }
  func.func @transform_4(%arg0: i32, %arg1: i32) -> i32 {
    %c0_i32 = arith.constant 0 : i32
    %c0_i32_0 = arith.constant 0 : i32
    return %c0_i32 : i32
  }
  func.func @transform_5(%arg0: i32, %arg1: i32) -> (i32, i32, i32, i32) {
    %c0_i32 = arith.constant 0 : i32
    %c0_i32_0 = arith.constant 0 : i32
    %c0_i32_1 = arith.constant 0 : i32
    return %arg0, %c0_i32, %arg1, %c0_i32_0 : i32, i32, i32, i32
  }
}

</mosaic_0001>

<bundles_post_ra>
// kernel: tpu_custom_call.1
= control target key start
LH: loop header
LB: loop body
LE: loop exit
PB: predicated region body
PF: predicated region fallthrough
CT: control target
= control target key end

     0   :  { %s2639_s0 = inlined_call_operand.hbm [shape: f32[2,10,16,128], index: 0, kind: input, shape index: {}]   ;;  %s2640_s1 = inlined_call_operand.hbm [shape: f32[2,10,16,128], index: 1, kind: input, shape index: {}]   ;;  %s2641_s2 = inlined_call_operand.hbm [shape: f32[2,10,16,128], index: 2, kind: input, shape index: {}]   ;;  %s2642_s3 = inlined_call_operand.hbm [shape: f32[8,10], index: 3, kind: input, shape index: {}]   ;;  %s2643_s4 = inlined_call_operand.vmem [shape: f32[8], index: 4, kind: input, shape index: {}]   ;;  %s2644_s5 = inlined_call_operand.hbm [shape: f32[2,8,16,128], index: 5, kind: output, shape index: {}]  }
   0x1   :  { %2718 = sst [smem:[#allocation123_spill]] %s2639_s0 }
   0x2   :  { %2719 = sst [smem:[#allocation124_spill]] %s2640_s1 }
   0x3   :  { %2720 = sst [smem:[#allocation125_spill]] %s2641_s2 }
   0x4   :  { %2721 = sst [smem:[#allocation126_spill]] %s2642_s3 }
   0x5   :  { %2722 = sst [smem:[#allocation127_spill]] %s2643_s4 }
   0x6   :  { %2723 = sst [smem:[#allocation128_spill]] %s2644_s5 }
   0x7   :  { %10 = vsyncpa [#allocation3], 0 }
   0x8   :  { %12 = vsyncpa [#allocation3 + $0x1], 0 }
   0x9   :  { %13 = vsyncpa [#allocation8], 0 }
   0xa   :  { %15 = vsyncpa [#allocation8 + $0x1], 0 }
   0xb   :  { %16 = vsyncpa [#allocation5], 0 }
   0xc   :  { %17 = vsyncpa [#allocation6], 0 }
   0xd   :  { %18 = vsyncpa [#allocation4], 0 }
   0xe   :  { %20 = vsyncpa [#allocation4 + $0x1], 0  ;;  %s1625_s18 = smov 0   ;;  %s1627_s19 = smov 0  }
   0xf   :  { %s1629_s20 = smov 0   ;;  %s1631_s21 = smov 0  }
  0x10   :  { %s1633_s22 = smov 0   ;;  %s1635_s23 = smov 0  }
  0x11   :  { %s1637_s24 = smov 0   ;;  %s1639_s25 = smov 0  }
  0x12   :  { %s1641_s26 = smov 0   ;;  %s1643_s27 = smov 0  }
  0x13   :  { %s1645_s28 = smov 0   ;;  %s1647_s29 = smov 0  }
  0x14   :  { %s1649_s30 = smov 0   ;;  %s1651_s6 = smov 0  }
  0x15 LB: > { %2724 = sst [smem:[#allocation19_spill]] %s1531_s19  ;;  %s35_s7 = sadd.s32 1, %s1571_s29  ;;  %s1579_s6 = sphi %s1651_s6, %s26_s6   ;;  %s1575_s30 = sphi %s1649_s30, %s3031_s30   ;;  %s1571_s29 = sphi %s1647_s29, %s3030_s29   ;;  %s1567_s28 = sphi %s1645_s28, %s3029_s28   ;;  %s1563_s27 = sphi %s1643_s27, %s3028_s27   ;;  %s1559_s26 = sphi %s1641_s26, %s3027_s26   ;;  %s1555_s25 = sphi %s1639_s25, %s3026_s25   ;;  %s1551_s24 = sphi %s1637_s24, %s3025_s24   ;;  %s1547_s23 = sphi %s1635_s23, %s3034_s23   ;;  %s1543_s22 = sphi %s1633_s22, %s3023_s22   ;;  %s1539_s21 = sphi %s1631_s21, %s3022_s21   ;;  %s1535_s20 = sphi %s1629_s20, %s3021_s20   ;;  %s1531_s19 = sphi %s1627_s19, %s3020_s19   ;;  %s1527_s18 = sphi %s1625_s18, %s3033_s18  }
  0x16   : > { %2725 = sst [smem:[#allocation20_spill]] %s1535_s20  ;;  %s38_s8 = sadd.s32 1, %s1575_s30 }
  0x17   : > { %2726 = sst [smem:[#allocation21_spill]] %s1543_s22  ;;  %p36_p0 = scmp.ge.s32.totalorder %s35_s7, 2 }
  0x18   : > { %2727 = sst [smem:[#allocation22_spill]] %s1547_s23  ;;  %p2653_p1 = scmp.eq.s32.totalorder %s1579_s6, 0 }
  0x19   : > { %2728 = sst [smem:[#allocation23_spill]] %s1551_s24  ;;  %s81_s9 = sadd.s32 1, %s1547_s23 }
  0x1a   : > { %2729 = sst [smem:[#allocation24_spill]] %s1555_s25  ;;  %s3036_s7 = smov (%p36_p0, %s35_s7), 0 }
  0x1b   : > { %2730 = sst [smem:[#allocation25_spill]] %s1559_s26  ;;  %s3038_s8 = smov (!%p36_p0, %s38_s8), %s1575_s30 }
  0x1c   : > { %2731 = sst [smem:[#allocation26_spill]] %s1563_s27  ;;  %s43_s10 = ssub.s32 %s1571_s29, %s3036_s7 }
  0x1d   : > { %2732 = sst [smem:[#allocation27_spill]] %s1567_s28  ;;  %p40_p2 = scmp.ge.s32.totalorder %s3038_s8, 2 }
  0x1e   : > { %2733 = sst [smem:[#allocation28_spill]] %s1571_s29  ;;  %p88_p3 = scmp.ne.s32.totalorder %s1547_s23, %s1543_s22 }
  0x1f   : > { %2734 = sst [smem:[#allocation29_spill]] %s1575_s30  ;;  %s3040_s8 = smov (%p40_p2, %s3038_s8), 0 }
  0x20   : > { %2735 = sst [smem:[#allocation30_spill]] %s1579_s6  ;;  %s1710_s11 = ssub.s32 %s1575_s30, %s3040_s8 }
  0x21   : > { %2736 = sst [smem:[#allocation31_spill]] %s3036_s7  ;;  %s1713_s12 = sor.u32 %s43_s10, %s1710_s11 }
  0x22   : > { %2737 = sst [smem:[#allocation32_spill]] %s3040_s8  ;;  %p1717_p4 = por %p88_p3, %p2653_p1 }
  0x23   : > { %p2652_p6 = scmp.lt.s32.totalorder %s1579_s6, 4  ;;  %p2650_p7 = scmp.eq.s32.totalorder %s1710_s11, 0 }
  0x24   : > { %s264_s15 = sand.u32 1, %s1579_s6   ;;  %s266_s16 = sand.u32 1, %s1547_s23  }
  0x25   : > { %s1730_s17 = scalar_select %p2650_p7, %s1547_s23, %s81_s9  }
  0x26   : > { %s1017_s8 = sshll.u32 %s266_s16, 4  ;;  %s2651_s10 = smul.u32 2560, %s1575_s30 }
  0x27   : > { %2739 = sst [smem:[#allocation33_spill]] %s1730_s17  ;;  %s268_s27 = scalar_lea.vmem [#allocation7], %s1017_s8 }
  0x28   : > { %s2740_s1 = sld [smem:[#allocation124_spill]]  ;;  %s280_s2 = sshll.u32 %s268_s27, 4  ;;  %s1740_s2 = int_to_ptr.vmem [resolvable:$true] %s280_s2 }
  0x29   : > { %p1746_p8 = pnand %p2652_p6, %p1717_p4  ;;  %s1750_s16 = scalar_lea.sflag [#allocation8], %s264_s15 }
  0x2b   : > { %p1305_p10 = pneg %p1746_p8 }
  0x2e   : > { %s896_s28 = scalar_lea.hbm %s2740_s1, %s2651_s10  ;;  %s1308_s7 = scalar_lea.hbm %s2740_s1, 5120 }
  0x2f   : > { %s1738_s20 = scalar_lea.hbm %s896_s28, 1536  ;;  %s1331_s14 = scalar_lea.hbm %s896_s28, 1792 }
  0x30   : > { %p1304_p9 = scmp.ne.s32.totalorder %s1738_s20, %s1331_s14  ;;  %p1309_p13 = scmp.lt.s32.totalorder %s1738_s20, %s2740_s1 }
  0x31   : > { %p1310_p0 = scmp.lt.s32.totalorder %s1308_s7, %s1331_s14 }
  0x32   : > { %p1306_p11 = pnand %p1305_p10, %p1304_p9 }
  0x33   : > { %p1311_p2 = por %p1310_p0, %p1309_p13 }
  0x34   : > { %p1307_p12 = pneg %p1306_p11 }
  0x36   : > { %p1312_p3 = pnand %p1311_p2, %p1307_p12 }
  0x38   : > { %1315 = shalt.err (!%p1312_p3)
}
  0x39   : > { %s1316_s28 = scalar_lea.vmem %s1740_s2, 256  ;;  %s1581_s15 = smov [#allocation7]  }
  0x3a   : > { %p1317_p4 = scmp.ne.s32.totalorder %s1740_s2, %s1316_s28  ;;  %s1321_s10 = sshll.u32 %s1581_s15, 4  ;;  %s1322_s10 = int_to_ptr.vmem [resolvable:$false] %s1321_s10 }
  0x3b   : > { %s1323_s5 = scalar_lea.vmem %s1322_s10, 512  ;;  %p1324_p11 = scmp.lt.s32.totalorder %s1740_s2, %s1322_s10 }
  0x3c   : > { %p1319_p7 = pnand %p1317_p4, %p1305_p10  ;;  %p1325_p6 = scmp.lt.s32.totalorder %s1323_s5, %s1316_s28 }
  0x3e   : > { %p1320_p9 = pneg %p1319_p7  ;;  %p1326_p1 = por %p1325_p6, %p1324_p11 }
  0x40   : > { %p1327_p5 = pnand %p1326_p1, %p1320_p9 }
  0x42   : > { %1330 = shalt.err (!%p1327_p5)
}
  0x43   : > { %s2654_s14 = smov 256   ;;  %s2656_s10 = smov 128  }
  0x44   : > { %s2658_s27 = smov 8   ;;  %s1774_s7 = sadd.s32 4294967295, %s1579_s6  }
  0x45   : > { %1167 = dma.hbm_to_vmem [thread:$0]  (!%p1746_p8), %s1738_s20, 256, %s1740_s2, %s1750_s16, %s2654_s14, %s2656_s10, %s2658_s27  }
  0x46   : > { %s1009_s8 = sadd.s32 4294967294, %s1579_s6   ;;  %p60_p1 = scmp.ne.s32.totalorder %s1555_s25, %s1551_s24 }
  0x47   : > { %p2660_p5 = scmp.eq.s32.totalorder %s1774_s7, 0  ;;  %p94_p6 = scmp.ne.s32.totalorder %s1543_s22, %s1539_s21 }
  0x48   : > { %p128_p7 = scmp.ne.s32.totalorder %s1531_s19, %s1527_s18  ;;  %p202_p0 = scmp.eq.s32.totalorder %s1009_s8, 3 }
  0x49   : > { %p1786_p8 = por %p2660_p5, %p60_p1  ;;  %p1793_p12 = por %p94_p6, %p2660_p5 }
  0x4a   : > { %p1799_p13 = por %p128_p7, %p2660_p5  ;;  %p1012_p2 = scmp.ge.s32.totalorder %s1579_s6, 1 }
  0x4b   : > { %p209_p3 = scmp.lt.s32.totalorder %s1579_s6, 5  ;;  %p1805_p4 = por %p202_p0, %p60_p1 }
  0x4c   : > { %s2744_s21 = scalar_select %p1799_p13, 1, 0 }
  0x4d   : > { %s2745_s18 = scalar_select %p1805_p4, 1, 0 }
  0x4e   : > { %p1809_p9 = pnand %p1012_p2, %p209_p3  ;;  %s2748_s4 = sld [smem:[#allocation127_spill]] }
  0x4f   : > { %2746 = sst [smem:[#allocation34_spill]] %s2745_s18  ;;  %s2749_s5 = smul.u32 20, %s1575_s30 }
  0x50   : > { %p1154_p11 = pneg %p1809_p9  ;;  %s47_s10 = sadd.s32 1, %s1559_s26 }
  0x51   : > { %s251_s8 = sadd.s32 %s1571_s29, %s2749_s5  ;;  %p2751_p1 = scmp.eq.s32.totalorder %s1713_s12, 0 }
  0x52   : > { %p1823_p6 = pnand %p1154_p11, %p2660_p5  ;;  %p54_p7 = scmp.ne.s32.totalorder %s1559_s26, %s1555_s25 }
  0x53   : > { %s1831_s27 = scalar_select %p2751_p1, %s1559_s26, %s47_s10  }
  0x54   : > { %s231_s15 = sshll.u32 %s2748_s4, 4  ;;  %s1585_s13 = smov [#allocation10]   ;;  %s232_s15 = int_to_ptr.vmem [resolvable:$true] %s231_s15 }
  0x55   : > { %2752 = sst [smem:[#allocation35_spill]] %s1831_s27  ;;  %s1343_s4 = scalar_lea.vmem %s232_s15, 16 }
  0x56   : > { %s2753_s3 = sld [smem:[#allocation126_spill]]  ;;  %p1344_p0 = scmp.ne.s32.totalorder %s232_s15, %s1343_s4 }
  0x57   : > { %p1345_p2 = pneg %p1823_p6  ;;  %p1351_p5 = scmp.lt.s32.totalorder %s232_s15, %s232_s15 }
  0x58   : > { %p1352_p10 = scmp.lt.s32.totalorder %s1343_s4, %s1343_s4 }
  0x59   : > { %p1346_p3 = pnand %p1345_p2, %p1344_p0 }
  0x5a   : > { %p1353_p4 = por %p1352_p10, %p1351_p5 }
  0x5b   : > { %p1347_p11 = pneg %p1346_p3 }
  0x5c   : > { %1157 = dma.hbm_to_smem (!%p1823_p6), %s2753_s3, 128, %s1585_s13, [#allocation5]  }
  0x5d   : > { %p1354_p13 = pnand %p1353_p4, %p1347_p11 }
  0x5f   : > { %1357 = shalt.err (!%p1354_p13)
}
  0x60   : > { %s1586_s12 = smov [#allocation11]   ;;  %p2754_p1 = scmp.eq.s32.totalorder %s1579_s6, 0 }
  0x61   : > { %1160 = dma.vmem_to_smem (!%p1823_p6), %s232_s15, 16, %s1586_s12, [#allocation6]  }
  0x62   : > { %p56_p0 = por %p2754_p1, %p54_p7  ;;  %p2755_p2 = scmp.eq.s32.totalorder %s1774_s7, 3 }
  0x63   : > { %s242_s4 = sand.u32 1, %s1559_s26   ;;  %s1016_s14 = sshll.u32 %s251_s8, 7 }
  0x64   : > { %p1854_p5 = por %p2755_p2, %p54_p7  ;;  %s1135_s10 = smul.u32 80, %s242_s4 }
  0x65   : > { %s2758_s0 = sld [smem:[#allocation123_spill]]  ;;  %p2759_p10 = scmp.lt.s32.totalorder %s1579_s6, 4 }
  0x66   : > { %s2756_s1 = scalar_select %p1854_p5, 1, 0 }
  0x67   : > { %p1864_p13 = pnand %p2759_p10, %p56_p0  ;;  %s246_s15 = scalar_lea.vmem [#allocation2], %s1135_s10 }
  0x68   : > { %2757 = sst [smem:[#allocation36_spill]] %s2756_s1  ;;  %s254_s12 = sshll.u32 %s246_s15, 4  ;;  %s255_s12 = int_to_ptr.vmem [resolvable:$true] %s254_s12 }
  0x69   : > { %s243_s29 = scalar_lea.sflag [#allocation3], %s242_s4  ;;  %p1360_p4 = pneg %p1864_p13 }
  0x6a   : > { %s1371_s27 = scalar_lea.vmem %s255_s12, 1280  ;;  %s1587_s8 = smov [#allocation2]  }
  0x6b   : > { %s253_s28 = scalar_lea.hbm %s2758_s0, %s1016_s14  ;;  %p1372_p6 = scmp.ne.s32.totalorder %s255_s12, %s1371_s27 }
  0x6c   : > { %s1376_s26 = sshll.u32 %s1587_s8, 4  ;;  %s1377_s26 = int_to_ptr.vmem [resolvable:$false] %s1376_s26 }
  0x6d   : > { %p1374_p7 = pnand %p1372_p6, %p1360_p4  ;;  %s1378_s14 = scalar_lea.vmem %s1377_s26, 2560 }
  0x6e   : > { %p1379_p11 = scmp.lt.s32.totalorder %s255_s12, %s1377_s26  ;;  %p1380_p1 = scmp.lt.s32.totalorder %s1378_s14, %s1371_s27 }
  0x6f   : > { %p1375_p3 = pneg %p1374_p7 }
  0x70   : > { %p1381_p0 = por %p1380_p1, %p1379_p11 }
  0x72   : > { %p1382_p2 = pnand %p1381_p0, %p1375_p3 }
  0x74   : > { %1385 = shalt.err (!%p1382_p2)
}
  0x75   : > { %s2761_s10 = smov 8   ;;  %s2762_s5 = smov 128  }
  0x76   : > { %s2763_s4 = smov 256   ;;  %s2764_s13 = sld [smem:[#allocation20_spill]] }
  0x77   : > { %1164 = dma.hbm_to_vmem [thread:$0]  (!%p1864_p13), %s253_s28, 1280, %s255_s12, %s243_s29, %s2763_s4, %s2762_s5, %s2761_s10  }
  0x78   : > { %p2765_p4 = scmp.eq.s32.totalorder %s1579_s6, 0  ;;  %p2766_p7 = scmp.eq.s32.totalorder %s1710_s11, 0 }
  0x79   : > { %s2768_s14 = smul.u32 2560, %s1575_s30  ;;  %s2769_s18 = sld [smem:[#allocation125_spill]] }
  0x7a   : > { %p2770_p3 = scmp.lt.s32.totalorder %s1579_s6, 4  ;;  %s1588_s11 = smov [#allocation9]  }
  0x7b   : > { %s1523_s0 = sadd.s32 128, %s2768_s14 }
  0x7c   : > { %s115_s26 = sadd.s32 1, %s2764_s13  ;;  %p122_p10 = scmp.ne.s32.totalorder %s2764_s13, %s1531_s19 }
  0x7d   : > { %s292_s27 = sand.u32 1, %s2764_s13   ;;  %s3042_s13 = smov (!%p2766_p7, %s2764_s13), %s115_s26 }
  0x7e   : > { %s1020_s15 = sshll.u32 %s292_s27, 4  ;;  %p124_p6 = por %p122_p10, %p2765_p4 }
  0x7f   : > { %s294_s3 = scalar_lea.vmem [#allocation9], %s1020_s15  ;;  %2767 = sst [smem:[#allocation37_spill]] %s3042_s13 }
  0x80   : > { %s306_s8 = sshll.u32 %s294_s3, 4  ;;  %s904_s24 = scalar_lea.hbm %s2769_s18, %s1523_s0  ;;  %s307_s8 = int_to_ptr.vmem [resolvable:$true] %s306_s8 }
  0x81   : > { %p1893_p13 = pnand %p2770_p3, %p124_p6  ;;  %s905_s28 = scalar_lea.hbm %s904_s24, 1024 }
  0x82   : > { %s1399_s12 = scalar_lea.vmem %s307_s8, 256  ;;  %s1404_s26 = sshll.u32 %s1588_s11, 4  ;;  %s1405_s26 = int_to_ptr.vmem [resolvable:$false] %s1404_s26 }
  0x83   : > { %p1388_p11 = pneg %p1893_p13  ;;  %p1400_p1 = scmp.ne.s32.totalorder %s307_s8, %s1399_s12 }
  0x84   : > { %s1406_s27 = scalar_lea.vmem %s1405_s26, 512  ;;  %p1407_p10 = scmp.lt.s32.totalorder %s307_s8, %s1405_s26 }
  0x85   : > { %p1402_p0 = pnand %p1400_p1, %p1388_p11  ;;  %p1408_p4 = scmp.lt.s32.totalorder %s1406_s27, %s1399_s12 }
  0x87   : > { %p1403_p2 = pneg %p1402_p0  ;;  %p1409_p7 = por %p1408_p4, %p1407_p10 }
  0x89   : > { %p1410_p5 = pnand %p1409_p7, %p1403_p2 }
  0x8b   : > { %1413 = shalt.err (!%p1410_p5)
}
  0x8c   : > { %1170 = dma.hbm_to_vmem [thread:$0]  (!%p1893_p13), %s905_s28, 256, %s307_s8, %s1750_s16, %s2763_s4, %s2762_s5, %s2761_s10  }
  0x8d   : > { %318 = sbr.rel (%p1809_p9) target bundleno = 416 (0x1a0), region = 40 }
  0x92   : > { %s1908_s0 = sand.u32 1, %s1555_s25  }
  0x93   : > { %2772 = sst [smem:[#allocation38_spill]] %s1908_s0  ;;  %s1137_s23 = smul.u32 80, %s1908_s0 }
  0x94   : > { %s321_s24 = scalar_lea.sflag [#allocation3], %s1908_s0 }
  0x95   : > { %s1912_s17 = scalar_lea.vmem [#allocation2], %s1137_s23 }
  0x96   : > { %1498 = dma.done.wait (%p1786_p8), %s321_s24, 1280  }
  0x97   : > { %1500 = vsyncadd (%p1786_p8), %s321_s24, 4294966016  ;;  %s329_s16 = sand.u32 1, %s1774_s7   ;;  %s331_s18 = sand.u32 1, %s1543_s22  }
  0x98   : > { %s1920_s9 = sshll.u32 %s331_s18, 4  ;;  %s330_s10 = scalar_lea.sflag [#allocation8], %s329_s16 }
  0x99   : > { %1502 = dma.done.wait (%p1793_p12), %s330_s10, 256  }
  0x9a   : > { %1504 = vsyncadd (%p1793_p12), %s330_s10, 4294967040  ;;  %s340_s4 = sand.u32 1, %s1531_s19   ;;  %p2773_p8 = scmp.ne.s32.totalorder %s2744_s21, 0 }
  0x9b   : > { %s1928_s2 = sshll.u32 %s340_s4, 4 }
  0x9c   : > { %1506 = dma.done.wait (%p2773_p8), %s330_s10, 256  }
  0x9d   : > { %1508 = vsyncadd (%p2773_p8), %s330_s10, 4294967040  ;;  %p2774_p9 = scmp.eq.s32.totalorder %s1774_s7, 0 }
  0x9f   : > { %1510 = dma.done.wait (%p2774_p9), [#allocation5], 128   ;;  %p2775_p5 = pmov %p2774_p9 }
  0xa1   : > { %1512 = vsyncadd (%p2775_p5), [#allocation5], 4294967168  ;;  %p2776_p12 = pmov %p2775_p5 }
  0xa2   : > { %p2777_p6 = pmov %p2775_p5 }
  0xa3   : > { %1514 = dma.done.wait (%p2776_p12), [#allocation6], 16  }
  0xa4   : > { %1516 = vsyncadd (%p2777_p6), [#allocation6], 4294967280 }
  0xa5   : > { %355 = sfence }
  0xa6   : > { %v414_v0 = vld [vmem:[%s1912_s17] sm:$0xff]  ;;  %v1029_v1 = vld [vmem:[%s1912_s17 + $0x10] sm:$0xff]  ;;  %s1589_s20 = smov 127   ;;  %s1590_s21 = smov 1   ;;  %v1028_v2 = vld [vmem:[%s1912_s17 + $0x8] sm:$0xff]  ;;  %v410_v4 = vlaneseq }
  0xa7   : > { %415 = vrot.lane.b32.xlu0 %v414_v0, %s1589_s20  ;;  %428 = vrot.lane.b32.xlu1 %v1029_v1, %s1590_s21  ;;  %v1030_v3 = vld [vmem:[%s1912_s17 + $0x18] sm:$0xff]  ;;  %s2778_s3 = sld [smem:[#allocation26_spill]]  ;;  %v1031_v5 = vld [vmem:[%s1912_s17 + $0x20] sm:$0xff] }
  0xa8   : > { %s1947_s8 = sld [smem:[#allocation10]]  ;;  %v1032_v6 = vld [vmem:[%s1912_s17 + $0x28] sm:$0xff]  ;;  %v1033_v9 = vld [vmem:[%s1912_s17 + $0x30] sm:$0xff]  ;;  %v413_v11 = vshrl.u32 %v410_v4, 7  ;;  %v1034_v17 = vld [vmem:[%s1912_s17 + $0x38] sm:$0xff]  ;;  %v441_v18 = vrot.slane %v1031_v5, 1 }
  0xa9   : > { %s1949_s7 = sld [smem:[#allocation11]]  ;;  %v452_v19 = vrot.slane %v1032_v6, 1  ;;  %v460_v20 = vrot.slane %v1033_v9, 7  ;;  %v471_v26 = vrot.slane %v1034_v17, 7  ;;  %v2107_v29 = vand.u32 127, %v410_v4 }
  0xaa   : > { %s1951_s14 = sld [smem:[#allocation10 + $0x80]]  ;;  %v447_v21 = vsub.s32 0, %v413_v11  ;;  %vm442_vm2 = vcmp.eq.s32.totalorder %v413_v11, 7  ;;  %vm461_vm3 = vcmp.eq.s32.totalorder %v413_v11, 0 }
  0xab   : > { %423 = vrot.lane.b32.xlu0 %v1028_v2, %s1589_s20  ;;  %436 = vrot.lane.b32.xlu1 %v1030_v3, %s1590_s21  ;;  %s1953_s29 = sld [smem:[#allocation11 + $0x1]]  ;;  %vm417_vm4 = vcmp.eq.s32.totalorder %v2107_v29, 127  ;;  %vm430_vm5 = vcmp.eq.s32.totalorder %v2107_v29, 0 }
  0xac   : > { %s1955_s28 = sld [smem:[#allocation10 + $0x100]] }
  0xad   : > { %s1957_s12 = sld [smem:[#allocation11 + $0x2]]  ;;  %p398_p3 = scmp.gt.s32.totalorder %s2778_s3, 0 }
  0xae   : > { %2779 = sst [smem:[#allocation39_spill]] %s1947_s8  ;;  %p404_p13 = scmp.lt.s32.totalorder %s2778_s3, 1  ;;  %v482_v27 = vstv %s1947_s8 }
  0xaf   : > { %2780 = sst [smem:[#allocation40_spill]] %s1949_s7 }
  0xb0   : > { %2781 = sst [smem:[#allocation41_spill]] %s1951_s14  ;;  %v488_v30 = vstv %s1951_s14 }
  0xb1   : > { %2782 = sst [smem:[#allocation42_spill]] %s1953_s29 }
  0xb2   : > { %2783 = sst [smem:[#allocation43_spill]] %s1955_s28  ;;  %v494_v36 = vstv %s1955_s28 }
  0xb3   : > { %2784 = sst [smem:[#allocation44_spill]] %s1957_s12 }
  0xb4   : > { %s1959_s11 = sld [smem:[#allocation10 + $0x180]] }
  0xb5   : > { %s1961_s26 = sld [smem:[#allocation11 + $0x3]] }
  0xb6   : > { %s1963_s27 = sld [smem:[#allocation10 + $0x200]] }
  0xb7   : > { %s1965_s23 = sld [smem:[#allocation11 + $0x4]] }
  0xb8   : > { %s1967_s24 = sld [smem:[#allocation10 + $0x280]] }
  0xb9   : > { %s1969_s16 = sld [smem:[#allocation11 + $0x5]] }
  0xba   : > { %2785 = sst [smem:[#allocation45_spill]] %s1959_s11  ;;  %v500_v38 = vstv %s1959_s11 }
  0xbb   : > { %2786 = sst [smem:[#allocation46_spill]] %s1961_s26 }
  0xbc   : > { %2787 = sst [smem:[#allocation47_spill]] %s1963_s27  ;;  %v657_v40 = vstv %s1963_s27 }
  0xbd   : > { %2788 = sst [smem:[#allocation48_spill]] %s1965_s23 }
  0xbe   : > { %2789 = sst [smem:[#allocation49_spill]] %s1967_s24  ;;  %v663_v42 = vstv %s1967_s24 }
  0xbf   : > { %2790 = sst [smem:[#allocation50_spill]] %s1969_s16 }
  0xc0   : > { %s1971_s18 = sld [smem:[#allocation10 + $0x300]] }
  0xc1   : > { %s1974_s10 = sld [smem:[#allocation11 + $0x6]] }
  0xc2   : > { %s1977_s4 = sld [smem:[#allocation10 + $0x380]] }
  0xc3   : > { %s1979_s20 = sld [smem:[#allocation11 + $0x7]] }
  0xc4   : > { %s1981_s21 = scalar_select %p398_p3, 1, 0 }
  0xc5   : > { %s1983_s15 = scalar_select %p404_p13, 1, 0 }
  0xc6   : > { %2791 = sst [smem:[#allocation51_spill]] %s1971_s18  ;;  %v400_v7 = vstv %s1981_s21 }
  0xc7   : > { %2792 = sst [smem:[#allocation52_spill]] %s1974_s10  ;;  %v406_v8 = vstv %s1983_s15  ;;  %vm2080_vm0 = vcmp.eq.s32.totalorder %v400_v7, 1 }
  0xc8   : > { %2793 = sst [smem:[#allocation53_spill]] %s1977_s4  ;;  %vm2084_vm1 = vcmp.eq.s32.totalorder %v406_v8, 1 }
  0xc9   : > { %2794 = sst [smem:[#allocation54_spill]] %s1979_s20 }
  0xca   : > { %s1985_s5 = sld [smem:[#allocation10 + $0x2]] }
  0xcb   : > { %s1987_s30 = sld [smem:[#allocation10 + $0x82]] }
  0xcc   : > { %s1989_s25 = sld [smem:[#allocation10 + $0x102]] }
  0xcd   : > { %s1991_s22 = sld [smem:[#allocation10 + $0x182]] }
  0xce   : > { %s1993_s13 = sld [smem:[#allocation10 + $0x202]] }
  0xcf   : > { %s1995_s19 = sld [smem:[#allocation10 + $0x282]] }
  0xd0   : > { %2795 = sst [smem:[#allocation55_spill]] %s1985_s5 }
  0xd1   : > { %2796 = sst [smem:[#allocation56_spill]] %s1987_s30 }
  0xd2   : > { %2797 = sst [smem:[#allocation57_spill]] %s1989_s25 }
  0xd3   : > { %2798 = sst [smem:[#allocation58_spill]] %s1991_s22 }
  0xd4   : > { %2799 = sst [smem:[#allocation59_spill]] %s1993_s13 }
  0xd5   : > { %2800 = sst [smem:[#allocation60_spill]] %s1995_s19 }
  0xd6   : > { %s1997_s6 = sld [smem:[#allocation10 + $0x302]] }
  0xd7   : > { %s1999_s1 = sld [smem:[#allocation10 + $0x382]] }
  0xd8   : > { %s2001_s3 = sld [smem:[#allocation10 + $0x1]] }
  0xd9   : > { %s2003_s0 = sld [smem:[#allocation10 + $0x81]] }
  0xda   : > { %s2005_s20 = sld [smem:[#allocation10 + $0x101]] }
  0xdb   : > { %s2007_s5 = sld [smem:[#allocation10 + $0x181]] }
  0xdc   : > { %2801 = sst [smem:[#allocation61_spill]] %s1997_s6 }
  0xdd   : > { %2802 = sst [smem:[#allocation62_spill]] %s1999_s1 }
  0xde   : > { %2803 = sst [smem:[#allocation63_spill]] %s2001_s3 }
  0xdf   : > { %2804 = sst [smem:[#allocation64_spill]] %s2003_s0 }
  0xe0   : > { %2805 = sst [smem:[#allocation65_spill]] %s2005_s20 }
  0xe1   : > { %2806 = sst [smem:[#allocation66_spill]] %s2007_s5 }
  0xe2   : > { %s2009_s30 = sld [smem:[#allocation10 + $0x201]] }
  0xe3   : > { %s2011_s25 = sld [smem:[#allocation10 + $0x281]] }
  0xe4   : > { %s2013_s22 = sld [smem:[#allocation10 + $0x301]] }
  0xe5   : > { %s2015_s13 = sld [smem:[#allocation10 + $0x381]] }
  0xe6   : > { %s2017_s19 = sld [smem:[#allocation10 + $0x3]] }
  0xe7   : > { %s2019_s6 = sld [smem:[#allocation10 + $0x83]] }
  0xe8   : > { %2807 = sst [smem:[#allocation67_spill]] %s2009_s30 }
  0xe9   : > { %2808 = sst [smem:[#allocation68_spill]] %s2011_s25 }
  0xea   : > { %2809 = sst [smem:[#allocation69_spill]] %s2013_s22 }
  0xeb   : > { %2810 = sst [smem:[#allocation70_spill]] %s2015_s13 }
  0xec   : > { %s2021_s1 = sld [smem:[#allocation10 + $0x103]] }
  0xed   : > { %2811 = sst [smem:[#allocation71_spill]] %s2019_s6 }
  0xee   : > { %s2023_s3 = sld [smem:[#allocation10 + $0x183]] }
  0xef   : > { %s2025_s0 = sld [smem:[#allocation10 + $0x4]] }
  0xf0   : > { %s2027_s20 = sld [smem:[#allocation10 + $0x84]] }
  0xf1   : > { %s2029_s5 = sld [smem:[#allocation10 + $0x104]] }
  0xf2   : > { %2812 = sst [smem:[#allocation72_spill]] %s2021_s1 }
  0xf3   : > { %s2031_s30 = sld [smem:[#allocation10 + $0x184]] }
  0xf4   : > { %2813 = sst [smem:[#allocation73_spill]] %s2023_s3 }
  0xf5   : > { %2814 = sst [smem:[#allocation74_spill]] %s2025_s0 }
  0xf6   : > { %2815 = sst [smem:[#allocation75_spill]] %s2027_s20 }
  0xf7   : > { %2816 = sst [smem:[#allocation76_spill]] %s2029_s5 }
  0xf8   : > { %s2033_s22 = sld [smem:[#allocation10 + $0x5]] }
  0xf9   : > { %2817 = sst [smem:[#allocation77_spill]] %s2031_s30 }
  0xfa   : > { %s2035_s13 = sld [smem:[#allocation10 + $0x85]] }
  0xfb   : > { %s2037_s6 = sld [smem:[#allocation10 + $0x105]] }
  0xfc   : > { %s2039_s1 = sld [smem:[#allocation10 + $0x185]] }
  0xfd   : > { %s2041_s3 = sld [smem:[#allocation10 + $0x6]] }
  0xfe   : > { %2818 = sst [smem:[#allocation78_spill]] %s2033_s22 }
  0xff   : > { %s2043_s20 = sld [smem:[#allocation10 + $0x86]] }
 0x100   : > { %2819 = sst [smem:[#allocation79_spill]] %s2035_s13 }
 0x101   : > { %2820 = sst [smem:[#allocation80_spill]] %s2037_s6 }
 0x102   : > { %s2045_s5 = sld [smem:[#allocation10 + $0x106]]  ;;  %v582_v15 = vstv %s2039_s1 }
 0x103   : > { %2821 = sst [smem:[#allocation81_spill]] %s2041_s3 }
 0x104   : > { %s2047_s30 = sld [smem:[#allocation10 + $0x186]] }
 0x105   : > { %2822 = sst [smem:[#allocation82_spill]] %s2043_s20 }
 0x106   : > { %s2049_s22 = sld [smem:[#allocation10 + $0x7]] }
 0x107   : > { %s2051_s13 = sld [smem:[#allocation10 + $0x87]] }
 0x108   : > { %s2053_s6 = sld [smem:[#allocation10 + $0x107]] }
 0x109   : > { %s2055_s0 = sld [smem:[#allocation10 + $0x187]] }
 0x10a   : > { %2823 = sst [smem:[#allocation83_spill]] %s2047_s30  ;;  %s2832_s30 = scalar_lea.vmem [#allocation9], %s1928_s2 }
 0x10b   : > { %s2057_s3 = sld [smem:[#allocation10 + $0x8]]  ;;  %v396_v13 = vld [vmem:[%s2832_s30] sm:$0x1] }
 0x10c   : > { %2824 = sst [smem:[#allocation84_spill]] %s2049_s22  ;;  %v408_v24 = vsel %vm2084_vm1, %v396_v13, 0.0 }
 0x10d   : > { %2825 = sst [smem:[#allocation85_spill]] %s2051_s13  ;;  %s2830_s13 = scalar_lea.vmem [#allocation7], %s1920_s9  ;;  %v448_v32 = vrot.slane %v408_v24, %v447_v21 }
 0x10e   : > { %2826 = sst [smem:[#allocation86_spill]] %s2053_s6  ;;  %v394_v10 = vld [vmem:[%s2830_s13 + $0x7] sm:$0x1] }
 0x10f   : > { %2827 = sst [smem:[#allocation87_spill]] %s2055_s0  ;;  %s2831_s0 = smov %s2830_s13  ;;  %v402_v22 = vsel %vm2080_vm0, %v394_v10, 0.0  ;;  %v2136_v48 = vsel %vm442_vm2, %v448_v32, %v441_v18  ;;  %v594_v18 = vstv %s2045_s5 }
 0x110   : > { %s2059_s20 = sld [smem:[#allocation10 + $0x88]]  ;;  %v395_v12 = vld [vmem:[%s2831_s0 + $0xf] sm:$0x1]  ;;  %v467_v34 = vrot.slane %v402_v22, %v447_v21 }
 0x111   : > { %2828 = sst [smem:[#allocation88_spill]] %s2057_s3  ;;  %v403_v23 = vsel %vm2080_vm0, %v395_v12, 0.0 }
 0x112   : > { %s2065_s22 = sld [smem:[#allocation10 + $0x108]]  ;;  %v475_v35 = vrot.slane %v403_v23, %v447_v21  ;;  %v2142_v50 = vsel %vm461_vm3, %v467_v34, %v460_v20 }
 0x113   : > { %s2070_s6 = sld [smem:[#allocation10 + $0x188]] }
 0x114   : > { %s2076_s3 = sld [smem:[#allocation10 + $0x9]]  ;;  %v2145_v51 = vsel %vm461_vm3, %v475_v35, %v471_v26 }
 0x115   : > { %s2088_s13 = sld [smem:[#allocation10 + $0x89]] }
 0x116   : > { %2829 = sst [smem:[#allocation89_spill]] %s2059_s20  ;;  %s2833_s20 = smov %s2832_s30 }
 0x117   : > { %v397_v14 = vld [vmem:[%s2833_s20 + $0x8] sm:$0x1]  ;;  %s2091_s0 = sld [smem:[#allocation10 + $0x109]] }
 0x118   : > { %s2093_s30 = sld [smem:[#allocation10 + $0x189]]  ;;  %v409_v25 = vsel %vm2084_vm1, %v397_v14, 0.0  ;;  %v626_v8 = vstv %s2065_s22 }
 0x119   : > { %s2103_s9 = sld [smem:[#allocation10 + $0x203]]  ;;  %v456_v33 = vrot.slane %v409_v25, %v447_v21  ;;  %v630_v6 = vstv %s2070_s6 }
 0x11a   : > { %s2109_s2 = sld [smem:[#allocation10 + $0x283]] }
 0x11b   : > { %s2113_s15 = sld [smem:[#allocation10 + $0x303]]  ;;  %v2139_v49 = vsel %vm442_vm2, %v456_v33, %v452_v19  ;;  %v2226_v33 = vld [vmem:[%s1912_s17 + $0x40] sm:$0xff]  ;;  %v638_v5 = vstv %s2088_s13 }
 0x11c   : > { %s2115_s21 = sld [smem:[#allocation10 + $0x383]]  ;;  %v2223_v32 = vmul.f32 %v582_v15, %v2139_v49 }
 0x11d   : > { %s2121_s29 = sld [smem:[#allocation10 + $0x204]] }
 0x11e   : > { %2838 = sst [smem:[#allocation90_spill]] %s2093_s30 }
 0x11f   : > { %2839 = sst [smem:[#allocation91_spill]] %s2103_s9 }
 0x120   : > { %2840 = sst [smem:[#allocation92_spill]] %s2109_s2 }
 0x121   : > { %2841 = sst [smem:[#allocation93_spill]] %s2113_s15 }
 0x122   : > { %2843 = sst [smem:[#allocation94_spill]] %s2115_s21 }
 0x123   : > { %2844 = sst [smem:[#allocation95_spill]] %s2121_s29 }
 0x124   : > { %s2127_s2 = sld [smem:[#allocation10 + $0x284]] }
 0x125   : > { %s2133_s26 = sld [smem:[#allocation10 + $0x304]] }
 0x126   : > { %s2856_s23 = sld [smem:[#allocation64_spill]] }
 0x127   : > { %s2147_s4 = sld [smem:[#allocation10 + $0x384]] }
 0x128   : > { %s2860_s20 = sld [smem:[#allocation67_spill]] }
 0x129   : > { %s2861_s18 = sld [smem:[#allocation69_spill]] }
 0x12a   : > { %2849 = sst [smem:[#allocation96_spill]] %s2127_s2 }
 0x12b   : > { %2854 = sst [smem:[#allocation97_spill]] %s2133_s26 }
 0x12c   : > { %s2153_s11 = sld [smem:[#allocation10 + $0x205]] }
 0x12d   : > { %2859 = sst [smem:[#allocation64_spill]] %s2147_s4 }
 0x12e   : > { %s2865_s26 = sld [smem:[#allocation72_spill]] }
 0x12f   : > { %s2866_s2 = sld [smem:[#allocation74_spill]] }
 0x130   : > { %s2159_s29 = sld [smem:[#allocation10 + $0x285]] }
 0x131   : > { %s2868_s7 = sld [smem:[#allocation75_spill]] }
 0x132   : > { %2863 = sst [smem:[#allocation67_spill]] %s2153_s11 }
 0x133   : > { %s2869_s14 = sld [smem:[#allocation76_spill]] }
 0x134   : > { %s2870_s8 = sld [smem:[#allocation77_spill]] }
 0x135   : > { %s2165_s15 = sld [smem:[#allocation10 + $0x305]]  ;;  %v554_v7 = vstv %s2866_s2 }
 0x136   : > { %s2871_s11 = sld [smem:[#allocation78_spill]]  ;;  %v2197_v19 = vmul.f32 %v554_v7, %v2136_v48 }
 0x137   : > { %s2872_s9 = sld [smem:[#allocation79_spill]]  ;;  %v558_v9 = vstv %s2868_s7 }
 0x138   : > { %s2873_s30 = sld [smem:[#allocation80_spill]]  ;;  %v2203_v21 = vmul.f32 %v558_v9, %v2136_v48  ;;  %v2238_v9 = vmul.f32 %v594_v18, %v2142_v50  ;;  %v642_v18 = vstv %s2091_s0 }
 0x139   : > { %s2171_s12 = sld [smem:[#allocation10 + $0x385]]  ;;  %v562_v10 = vstv %s2869_s14 }
 0x13a   : > { %s2874_s28 = sld [smem:[#allocation81_spill]]  ;;  %v566_v11 = vstv %s2870_s8  ;;  %v2206_v22 = vmul.f32 %v562_v10, %v2136_v48  ;;  %v2241_v10 = vld [vmem:[%s1912_s17 + $0x48] sm:$0xff] }
 0x13b   : > { %s2875_s27 = sld [smem:[#allocation82_spill]]  ;;  %v2209_v23 = vmul.f32 %v566_v11, %v2136_v48  ;;  %v753_v59 = vstv %s2165_s15 }
 0x13c   : > { %s2177_s10 = sld [smem:[#allocation10 + $0x206]]  ;;  %v570_v12 = vstv %s2871_s11  ;;  %v2347_v53 = vmul.f32 %v753_v59, %v2139_v49 }
 0x13d   : > { %s2876_s16 = sld [smem:[#allocation83_spill]]  ;;  %v574_v13 = vstv %s2872_s9  ;;  %v2214_v24 = vmul.f32 %v570_v12, %v2139_v49 }
 0x13e   : > { %s2183_s25 = sld [smem:[#allocation10 + $0x286]]  ;;  %v578_v14 = vstv %s2873_s30  ;;  %v2217_v25 = vmul.f32 %v574_v13, %v2139_v49 }
 0x13f   : > { %s2189_s24 = sld [smem:[#allocation10 + $0x306]]  ;;  %v2220_v26 = vmul.f32 %v578_v14, %v2139_v49  ;;  %v757_v58 = vstv %s2171_s12 }
 0x140   : > { %v586_v16 = vstv %s2874_s28  ;;  %s2877_s21 = sld [smem:[#allocation84_spill]] }
 0x141   : > { %v590_v17 = vstv %s2875_s27  ;;  %s2194_s2 = sld [smem:[#allocation10 + $0x386]]  ;;  %v2232_v35 = vmul.f32 %v586_v16, %v2142_v50 }
 0x142   : > { %s2200_s8 = sld [smem:[#allocation10 + $0x207]]  ;;  %v2235_v7 = vmul.f32 %v590_v17, %v2142_v50  ;;  %v634_v17 = vstv %s2076_s3 }
 0x143   : > { %v598_v20 = vstv %s2876_s16  ;;  %s2878_s7 = sld [smem:[#allocation85_spill]] }
 0x144   : > { %s2879_s1 = sld [smem:[#allocation86_spill]]  ;;  %v2249_v14 = vmul.f32 %v598_v20, %v2142_v50  ;;  %v765_v57 = vstv %s2183_s25 }
 0x145   : > { %s2880_s14 = sld [smem:[#allocation87_spill]] }
 0x146   : > { %s2211_s5 = sld [smem:[#allocation10 + $0x287]]  ;;  %v602_v34 = vstv %s2877_s21 }
 0x147   : > { %s2881_s28 = sld [smem:[#allocation88_spill]]  ;;  %v2266_v3 = vmul.f32 %v602_v34, %v2145_v51  ;;  %v2284_v34 = vmul.f32 %v2226_v33, %v626_v8 }
 0x148   : > { %s2882_s11 = sld [smem:[#allocation89_spill]] }
 0x149   : > { %s2229_s27 = sld [smem:[#allocation10 + $0x307]]  ;;  %v606_v11 = vstv %s2878_s7  ;;  %2892 = vst [vmem:[#allocation101_spill] sm:$0xff] %v2284_v34  ;;  %v2969_v34 = vstv %s2860_s20 }
 0x14a   : > { %s2883_s16 = sld [smem:[#allocation90_spill]]  ;;  %v610_v12 = vstv %s2879_s1  ;;  %v2269_v20 = vmul.f32 %v606_v11, %v2145_v51  ;;  %v2287_v11 = vmul.f32 %v2226_v33, %v630_v6  ;;  %v761_v6 = vstv %s2177_s10 }
 0x14b   : > { %v614_v13 = vstv %s2880_s14  ;;  %s2246_s30 = sld [smem:[#allocation10 + $0x387]]  ;;  %v2272_v2 = vmul.f32 %v610_v12, %v2145_v51  ;;  %v2292_v12 = vmul.f32 %v2241_v10, %v634_v17  ;;  %v2353_v52 = vmul.f32 %v761_v6, %v2142_v50 }
 0x14c   : > { %s2255_s9 = sld [smem:[#allocation10 + $0x208]]  ;;  %v2275_v1 = vmul.f32 %v614_v13, %v2145_v51  ;;  %2894 = vst [vmem:[#allocation102_spill] sm:$0xff] %v2287_v11  ;;  %v2295_v13 = vmul.f32 %v2241_v10, %v638_v5  ;;  %v781_v47 = vstv %s2211_s5 }
 0x14d   : > { %v618_v15 = vstv %s2881_s28  ;;  %s2261_s17 = sld [smem:[#allocation10 + $0x288]]  ;;  %2896 = vst [vmem:[#allocation103_spill] sm:$0xff] %v2292_v12  ;;  %2902 = vst [vmem:[#allocation107_spill] sm:$0xff] %v2353_v52 }
 0x14e   : > { %v622_v16 = vstv %s2882_s11  ;;  %s2884_s21 = sld [smem:[#allocation91_spill]]  ;;  %2888 = vst [vmem:[#allocation98_spill] sm:$0xff] %v2275_v1  ;;  %v2278_v0 = vmul.f32 %v2226_v33, %v618_v15  ;;  %2898 = vst [vmem:[#allocation104_spill] sm:$0xff] %v2295_v13  ;;  %v2298_v15 = vmul.f32 %v2241_v10, %v642_v18 }
 0x14f   : > { %s2263_s7 = sld [smem:[#allocation10 + $0x308]]  ;;  %v2281_v63 = vmul.f32 %v2226_v33, %v622_v16  ;;  %v785_v45 = vstv %s2229_s27 }
 0x150   : > { %v646_v4 = vstv %s2883_s16  ;;  %s2885_s1 = sld [smem:[#allocation92_spill]]  ;;  %2889 = vst [vmem:[#allocation99_spill] sm:$0xff] %v2278_v0  ;;  %2899 = vst [vmem:[#allocation105_spill] sm:$0xff] %v2298_v15 }
 0x151   : > { %s2886_s14 = sld [smem:[#allocation95_spill]]  ;;  %2890 = vst [vmem:[#allocation100_spill] sm:$0xff] %v2281_v63  ;;  %v2301_v8 = vmul.f32 %v2241_v10, %v646_v4  ;;  %v749_v4 = vstv %s2159_s29 }
 0x152   : > { %s2887_s22 = sld [smem:[#allocation96_spill]]  ;;  %v793_v43 = vstv %s2255_s9 }
 0x153   : > { %s2891_s6 = sld [smem:[#allocation97_spill]]  ;;  %2900 = vst [vmem:[#allocation106_spill] sm:$0xff] %v2301_v8  ;;  %v797_v41 = vstv %s2261_s17  ;;  %v2382_v28 = vmul.f32 %v2226_v33, %v793_v43 }
 0x154   : > { %s2893_s3 = sld [smem:[#allocation64_spill]] }
 0x155   : > { %s2895_s13 = sld [smem:[#allocation67_spill]]  ;;  %v801_v39 = vstv %s2263_s7  ;;  %2910 = vst [vmem:[#allocation113_spill] sm:$0xff] %v2382_v28 }
 0x156   : > { %s2289_s0 = sld [smem:[#allocation10 + $0x388]]  ;;  %v2394_v43 = vmul.f32 %v2226_v33, %v801_v39 }
 0x157   : > { %s2897_s28 = sld [smem:[#allocation93_spill]]  ;;  %v729_v17 = vstv %s2886_s14 }
 0x158   : > { %s2303_s11 = sld [smem:[#allocation10 + $0x209]]  ;;  %v733_v62 = vstv %s2887_s22  ;;  %v2326_v56 = vmul.f32 %v729_v17, %v2136_v48  ;;  %v2343_v17 = vmul.f32 %v749_v4, %v2139_v49  ;;  %v789_v4 = vstv %s2246_s30  ;;  %2920 = vst [vmem:[#allocation117_spill] sm:$0xff] %v2394_v43 }
 0x159   : > { %s2901_s16 = sld [smem:[#allocation94_spill]]  ;;  %v737_v5 = vstv %s2891_s6  ;;  %v2329_v55 = vmul.f32 %v733_v62, %v2136_v48  ;;  %v769_v62 = vstv %s2189_s24 }
 0x15a   : > { %s2309_s4 = sld [smem:[#allocation10 + $0x289]]  ;;  %v741_v18 = vstv %s2893_s3  ;;  %v2334_v60 = vmul.f32 %v737_v5, %v2136_v48  ;;  %v2350_v5 = vmul.f32 %v757_v58, %v2139_v49 }
 0x15b   : > { %v745_v61 = vstv %s2895_s13  ;;  %s2323_s14 = sld [smem:[#allocation10 + $0x309]]  ;;  %v2337_v16 = vmul.f32 %v741_v18, %v2136_v48  ;;  %v773_v48 = vstv %s2194_s2  ;;  %v777_v18 = vstv %s2200_s8 }
 0x15c   : > { %s2331_s29 = sld [smem:[#allocation10 + $0x389]]  ;;  %v2340_v54 = vmul.f32 %v745_v61, %v2139_v49  ;;  %v2359_v61 = vmul.f32 %v765_v57, %v2142_v50  ;;  %v805_v37 = vstv %s2289_s0  ;;  %v2370_v49 = vmul.f32 %v769_v62, %v2142_v50 }
 0x15d   : > { %v2373_v58 = vmul.f32 %v773_v48, %v2142_v50  ;;  %v2376_v6 = vmul.f32 %v777_v18, %v2145_v51  ;;  %v2379_v57 = vmul.f32 %v781_v47, %v2145_v51  ;;  %v2385_v62 = vmul.f32 %v2226_v33, %v797_v41  ;;  %v416_v18 = vpop.permute.xlu0 %415  ;;  %s2918_s2 = sld [smem:[#allocation51_spill]]  ;;  %v429_v47 = vpop.permute.xlu1 %428 }
 0x15e   : > { %2903 = vst [vmem:[#allocation108_spill] sm:$0xff] %v2359_v61  ;;  %v809_v59 = vstv %s2303_s11  ;;  %2904 = vst [vmem:[#allocation109_spill] sm:$0xff] %v2370_v49  ;;  %v2388_v50 = vmul.f32 %v785_v45, %v2145_v51  ;;  %v2391_v48 = vmul.f32 %v789_v4, %v2145_v51  ;;  %s2919_s8 = sld [smem:[#allocation53_spill]]  ;;  %v2397_v41 = vmul.f32 %v2226_v33, %v805_v37 }
 0x15f   : > { %2905 = vst [vmem:[#allocation110_spill] sm:$0xff] %v2373_v58  ;;  %2906 = vst [vmem:[#allocation111_spill] sm:$0xff] %v2376_v6  ;;  %s2921_s5 = sld [smem:[#allocation40_spill]]  ;;  %v2400_v45 = vmul.f32 %v2241_v10, %v809_v59  ;;  %v420_v51 = vsel %vm417_vm4, 0.0, %v416_v18  ;;  %v433_v4 = vsel %vm430_vm5, 0.0, %v429_v47 }
 0x160   : > { %v813_v31 = vstv %s2309_s4  ;;  %2908 = vst [vmem:[#allocation112_spill] sm:$0xff] %v2379_v57  ;;  %2912 = vst [vmem:[#allocation114_spill] sm:$0xff] %v2385_v62  ;;  %s2923_s27 = sld [smem:[#allocation42_spill]]  ;;  %v483_v37 = vmul.f32 %v482_v27, %v420_v51  ;;  %v489_v33 = vmul.f32 %v488_v30, %v420_v51  ;;  %v495_v59 = vmul.f32 %v494_v36, %v420_v51 }
 0x161   : > { %2914 = vst [vmem:[#allocation115_spill] sm:$0xff] %v2388_v50  ;;  %2916 = vst [vmem:[#allocation116_spill] sm:$0xff] %v2391_v48  ;;  %v2403_v46 = vmul.f32 %v2241_v10, %v813_v31  ;;  %s2926_s30 = sld [smem:[#allocation44_spill]]  ;;  %v817_v39 = vstv %s2323_s14  ;;  %v501_v31 = vmul.f32 %v500_v38, %v420_v51  ;;  %v658_v18 = vmul.f32 %v657_v40, %v420_v51 }
 0x162   : > { %2922 = vst [vmem:[#allocation118_spill] sm:$0xff] %v2397_v41  ;;  %2924 = vst [vmem:[#allocation119_spill] sm:$0xff] %v2400_v45  ;;  %s2927_s9 = sld [smem:[#allocation46_spill]]  ;;  %v821_v44 = vstv %s2331_s29  ;;  %v664_v47 = vmul.f32 %v663_v42, %v420_v51  ;;  %v2432_v38 = vmul.f32 %v2241_v10, %v817_v39  ;;  %v2966_v57 = vstv %s2856_s23 }
 0x163   : > { %2925 = vst [vmem:[#allocation120_spill] sm:$0xff] %v2403_v46  ;;  %s2928_s17 = sld [smem:[#allocation48_spill]]  ;;  %v2933_v46 = vstv %s2918_s2  ;;  %v2435_v40 = vmul.f32 %v2241_v10, %v821_v44 }
 0x164   : > { %s2929_s7 = sld [smem:[#allocation50_spill]]  ;;  %v670_v45 = vmul.f32 %v2933_v46, %v420_v51  ;;  %v2935_v41 = vstv %s2919_s8  ;;  %2942 = vst [vmem:[#allocation121_spill] sm:$0xff] %v2432_v38 }
 0x165   : > { %s2930_s22 = sld [smem:[#allocation52_spill]]  ;;  %v676_v43 = vmul.f32 %v2935_v41, %v420_v51  ;;  %v2937_v27 = vstv %s2921_s5  ;;  %2944 = vst [vmem:[#allocation122_spill] sm:$0xff] %v2435_v40 }
 0x166   : > { %s2931_s6 = sld [smem:[#allocation54_spill]]  ;;  %v486_v30 = vadd.f32 %v2937_v27, %v483_v37  ;;  %v2939_v62 = vstv %s2923_s27 }
 0x167   : > { %s2932_s3 = sld [smem:[#allocation55_spill]]  ;;  %v492_v36 = vadd.f32 %v2939_v62, %v489_v33  ;;  %v2945_v42 = vstv %s2926_s30  ;;  %v424_v62 = vpop.permute.xlu0 %423  ;;  %v437_v33 = vpop.permute.xlu1 %436 }
 0x168   : > { %s2934_s13 = sld [smem:[#allocation56_spill]]  ;;  %v498_v46 = vadd.f32 %v2945_v42, %v495_v59  ;;  %v2947_v28 = vstv %s2927_s9 }
 0x169   : > { %s2936_s0 = sld [smem:[#allocation57_spill]]  ;;  %v504_v8 = vadd.f32 %v2947_v28, %v501_v31  ;;  %v2948_v41 = vstv %s2928_s17 }
 0x16a   : > { %s2938_s11 = sld [smem:[#allocation58_spill]]  ;;  %v661_v51 = vadd.f32 %v2948_v41, %v658_v18  ;;  %v2949_v15 = vstv %s2929_s7 }
 0x16b   : > { %s2940_s14 = sld [smem:[#allocation59_spill]]  ;;  %v667_v37 = vadd.f32 %v2949_v15, %v664_v47  ;;  %v2952_v39 = vstv %s2930_s22 }
 0x16c   : > { %s2941_s29 = sld [smem:[#allocation60_spill]]  ;;  %v673_v27 = vadd.f32 %v2952_v39, %v670_v45  ;;  %v2954_v38 = vstv %s2931_s6 }
 0x16d   : > { %s2943_s25 = sld [smem:[#allocation61_spill]]  ;;  %v679_v44 = vadd.f32 %v2954_v38, %v676_v43  ;;  %v2955_v10 = vstv %s2932_s3  ;;  %v425_v43 = vsel %vm417_vm4, 0.0, %v424_v62  ;;  %v438_v38 = vsel %vm430_vm5, 0.0, %v437_v33  ;;  %s1591_s3 = smov [#allocation12]  }
 0x16e   : > { %s2946_s12 = sld [smem:[#allocation62_spill]]  ;;  %v523_v59 = vmul.f32 %v2955_v10, %v433_v4  ;;  %v2957_v42 = vstv %s2934_s13  ;;  %s1419_s13 = sshll.u32 %s1591_s3, 4  ;;  %s1420_s13 = int_to_ptr.vmem [resolvable:$false] %s1419_s13 }
 0x16f   : > { %s2950_s24 = sld [smem:[#allocation63_spill]]  ;;  %v527_v28 = vmul.f32 %v2957_v42, %v433_v4  ;;  %v2958_v31 = vstv %s2936_s0  ;;  %s1421_s0 = scalar_lea.vmem %s1420_s13, 2048 }
 0x170   : > { %s2951_s10 = sld [smem:[#allocation65_spill]]  ;;  %v531_v18 = vmul.f32 %v2958_v31, %v433_v4  ;;  %v2960_v15 = vstv %s2938_s11  ;;  %v511_v31 = vmul.f32 %v2966_v57, %v425_v43 }
 0x171   : > { %s2953_s4 = sld [smem:[#allocation66_spill]]  ;;  %v535_v47 = vmul.f32 %v2960_v15, %v433_v4  ;;  %v2961_v41 = vstv %s2940_s14 }
 0x172   : > { %s2956_s15 = sld [smem:[#allocation68_spill]]  ;;  %v698_v40 = vmul.f32 %v2961_v41, %v433_v4  ;;  %v2962_v13 = vstv %s2941_s29 }
 0x173   : > { %s2959_s2 = sld [smem:[#allocation70_spill]]  ;;  %v702_v12 = vmul.f32 %v2962_v13, %v433_v4  ;;  %v2963_v48 = vstv %s2943_s25  ;;  %v682_v13 = vmul.f32 %v2969_v34, %v425_v43 }
 0x174   : > { %v706_v45 = vmul.f32 %v2963_v48, %v433_v4  ;;  %v2964_v39 = vstv %s2946_s12  ;;  %s2972_s8 = sld [smem:[#allocation71_spill]] }
 0x175   : > { %v710_v50 = vmul.f32 %v2964_v39, %v433_v4  ;;  %v2965_v10 = vstv %s2950_s24  ;;  %v2971_v4 = vstv %s2861_s18  ;;  %s2974_s5 = sld [smem:[#allocation73_spill]]  ;;  %v683_v58 = vadd.f32 %v682_v13, %v661_v51 }
 0x176   : > { %v507_v42 = vmul.f32 %v2965_v10, %v425_v43  ;;  %v2967_v6 = vstv %s2951_s10  ;;  %v690_v39 = vmul.f32 %v2971_v4, %v425_v43  ;;  %v512_v10 = vadd.f32 %v511_v31, %v492_v36  ;;  %s2983_s23 = sld [smem:[#allocation38_spill]] }
 0x177   : > { %v515_v15 = vmul.f32 %v2967_v6, %v425_v43  ;;  %v2968_v11 = vstv %s2953_s4  ;;  %v2975_v4 = vstv %s2017_s19  ;;  %v699_v51 = vadd.f32 %v698_v40, %v683_v58  ;;  %s2981_s19 = sld [smem:[#allocation27_spill]] }
 0x178   : > { %v519_v41 = vmul.f32 %v2968_v11, %v425_v43  ;;  %v2970_v63 = vstv %s2956_s15  ;;  %v508_v33 = vadd.f32 %v507_v42, %v486_v30  ;;  %v691_v49 = vadd.f32 %v690_v39, %v673_v27  ;;  %s3007_s9 = sld [smem:[#allocation128_spill]] }
 0x179   : > { %v686_v48 = vmul.f32 %v2970_v63, %v425_v43  ;;  %v2973_v62 = vstv %s2959_s2  ;;  %v516_v0 = vadd.f32 %v515_v15, %v498_v46  ;;  %v528_v34 = vadd.f32 %v527_v28, %v512_v10  ;;  %s3008_s7 = sld [smem:[#allocation36_spill]] }
 0x17a   : > { %v694_v29 = vmul.f32 %v2973_v62, %v425_v43  ;;  %v520_v57 = vadd.f32 %v519_v41, %v504_v8  ;;  %v524_v61 = vadd.f32 %v523_v59, %v508_v33  ;;  %v539_v1 = vmul.f32 %v2975_v4, %v438_v38 }
 0x17b   : > { %v687_v6 = vadd.f32 %v686_v48, %v667_v37  ;;  %v532_v63 = vadd.f32 %v531_v18, %v516_v0  ;;  %v2976_v43 = vstv %s2972_s8  ;;  %v2977_v30 = vstv %s2865_s26  ;;  %s2985_s26 = sld [smem:[#allocation26_spill]] }
 0x17c   : > { %v695_v11 = vadd.f32 %v694_v29, %v679_v44  ;;  %v536_v52 = vadd.f32 %v535_v47, %v520_v57  ;;  %v543_v62 = vmul.f32 %v2976_v43, %v438_v38  ;;  %v547_v36 = vmul.f32 %v2977_v30, %v438_v38  ;;  %s1027_s20 = sshll.u32 %s2983_s23, 6  ;;  %v2992_v43 = vld [vmem:[#allocation100_spill] sm:$0xff]  ;;  %s833_s22 = scalar_lea.sflag [#allocation4], %s2983_s23 }
 0x17d   : > { %v2978_v46 = vstv %s2974_s5  ;;  %v703_v37 = vadd.f32 %v702_v12, %v687_v6  ;;  %v707_v27 = vadd.f32 %v706_v45, %v691_v49  ;;  %v540_v59 = vadd.f32 %v539_v1, %v524_v61  ;;  %s1131_s18 = sshll.u32 %s2981_s19, 4  ;;  %v2988_v6 = vld [vmem:[#allocation108_spill] sm:$0xff] }
 0x17e   : > { %v551_v8 = vmul.f32 %v2978_v46, %v438_v38  ;;  %v711_v44 = vadd.f32 %v710_v50, %v695_v11  ;;  %v544_v42 = vadd.f32 %v543_v62, %v528_v34  ;;  %v548_v28 = vadd.f32 %v547_v36, %v532_v63  ;;  %v2989_v11 = vld [vmem:[#allocation109_spill] sm:$0xff]  ;;  %v2990_v34 = vld [vmem:[#allocation110_spill] sm:$0xff]  ;;  %v2991_v63 = vld [vmem:[#allocation99_spill] sm:$0xff] }
 0x17f   : > { %v2979_v0 = vstv %s2884_s21  ;;  %v2980_v47 = vstv %s2885_s1  ;;  %v2982_v41 = vstv %s2897_s28  ;;  %v2984_v48 = vstv %s2901_s16  ;;  %s387_s28 = scalar_lea.vmem [#allocation12], %s1027_s20  ;;  %p3013_p1 = scmp.ne.s32.totalorder %s3008_s7, 0 }
 0x180   : > { %v552_v31 = vadd.f32 %v551_v8, %v536_v52  ;;  %v714_v18 = vmul.f32 %v2979_v0, %v438_v38  ;;  %v718_v15 = vmul.f32 %v2980_v47, %v438_v38  ;;  %v722_v13 = vmul.f32 %v2982_v41, %v438_v38  ;;  %v2996_v8 = vld [vmem:[#allocation112_spill] sm:$0xff]  ;;  %s847_s16 = sshll.u32 %s387_s28, 4  ;;  %s2558_s16 = int_to_ptr.vmem [resolvable:$true] %s847_s16 }
 0x181   : > { %v726_v39 = vmul.f32 %v2984_v48, %v438_v38  ;;  %v556_v29 = vadd.f32 %v2197_v19, %v540_v59  ;;  %v560_v12 = vadd.f32 %v2203_v21, %v544_v42  ;;  %v564_v49 = vadd.f32 %v2206_v22, %v548_v28  ;;  %s2524_s21 = sadd.s32 %s2985_s26, %s1131_s18  ;;  %v2999_v42 = vld [vmem:[#allocation103_spill] sm:$0xff]  ;;  %s1415_s6 = scalar_lea.vmem %s2558_s16, 1024 }
 0x182   : > { %v568_v1 = vadd.f32 %v2209_v23, %v552_v31  ;;  %v715_v61 = vadd.f32 %v714_v18, %v699_v51  ;;  %v719_v52 = vadd.f32 %v718_v15, %v703_v37  ;;  %v723_v58 = vadd.f32 %v722_v13, %v707_v27  ;;  %s1132_s1 = sshll.u32 %s2524_s21, 7  ;;  %v2997_v37 = vld [vmem:[#allocation115_spill] sm:$0xff]  ;;  %v3000_v31 = vld [vmem:[#allocation104_spill] sm:$0xff]  ;;  %v3001_v18 = vld [vmem:[#allocation105_spill] sm:$0xff]  ;;  %p1416_p11 = scmp.ne.s32.totalorder %s2558_s16, %s1415_s6 }
 0x183   : > { %v727_v50 = vadd.f32 %v726_v39, %v711_v44  ;;  %v572_v40 = vadd.f32 %v2214_v24, %v556_v29  ;;  %v576_v45 = vadd.f32 %v2217_v25, %v560_v12  ;;  %v580_v33 = vadd.f32 %v2220_v26, %v564_v49  ;;  %v2998_v44 = vld [vmem:[#allocation116_spill] sm:$0xff]  ;;  %v3002_v15 = vld [vmem:[#allocation106_spill] sm:$0xff]  ;;  %v3003_v13 = vld [vmem:[#allocation113_spill] sm:$0xff]  ;;  %s2556_s17 = scalar_lea.hbm %s3007_s9, %s1132_s1  ;;  %p1422_p10 = scmp.lt.s32.totalorder %s2558_s16, %s1420_s13 }
 0x184   : > { %v584_v38 = vadd.f32 %v2223_v32, %v568_v1  ;;  %v731_v19 = vadd.f32 %v2326_v56, %v715_v61  ;;  %v735_v21 = vadd.f32 %v2329_v55, %v719_v52  ;;  %v739_v22 = vadd.f32 %v2334_v60, %v723_v58  ;;  %v3004_v39 = vld [vmem:[#allocation114_spill] sm:$0xff]  ;;  %v3005_v12 = vld [vmem:[#allocation117_spill] sm:$0xff]  ;;  %v3009_v52 = vld [vmem:[#allocation119_spill] sm:$0xff]  ;;  %p1417_p0 = pnand %p1416_p11, %p3013_p1  ;;  %p1423_p4 = scmp.lt.s32.totalorder %s1421_s0, %s1415_s6 }
 0x185   : > { %v743_v23 = vadd.f32 %v2337_v16, %v727_v50  ;;  %v588_v10 = vadd.f32 %v2232_v35, %v572_v40  ;;  %v592_v24 = vadd.f32 %v2235_v7, %v576_v45  ;;  %v596_v25 = vadd.f32 %v2238_v9, %v580_v33  ;;  %v2986_v9 = vld [vmem:[#allocation98_spill] sm:$0xff]  ;;  %v2987_v16 = vld [vmem:[#allocation107_spill] sm:$0xff]  ;;  %v3010_v50 = vld [vmem:[#allocation120_spill] sm:$0xff] }
 0x186   : > { %v600_v26 = vadd.f32 %v2249_v14, %v584_v38  ;;  %v747_v32 = vadd.f32 %v2340_v54, %v731_v19  ;;  %v751_v57 = vadd.f32 %v2343_v17, %v735_v21  ;;  %v755_v56 = vadd.f32 %v2347_v53, %v739_v22  ;;  %v3006_v1 = vld [vmem:[#allocation118_spill] sm:$0xff]  ;;  %v3011_v45 = vld [vmem:[#allocation121_spill] sm:$0xff]  ;;  %p1418_p2 = pneg %p1417_p0  ;;  %p1424_p7 = por %p1423_p4, %p1422_p10 }
 0x187   : > { %v759_v55 = vadd.f32 %v2350_v5, %v743_v23  ;;  %v604_v60 = vadd.f32 %v2266_v3, %v588_v10  ;;  %v608_v35 = vadd.f32 %v2269_v20, %v592_v24  ;;  %v612_v7 = vadd.f32 %v2272_v2, %v596_v25  ;;  %v2993_v3 = vld [vmem:[#allocation101_spill] sm:$0xff]  ;;  %v2994_v20 = vld [vmem:[#allocation102_spill] sm:$0xff]  ;;  %v2995_v2 = vld [vmem:[#allocation111_spill] sm:$0xff] }
 0x188   : > { %v616_v14 = vadd.f32 %v2986_v9, %v600_v26  ;;  %v763_v54 = vadd.f32 %v2987_v16, %v747_v32  ;;  %v767_v17 = vadd.f32 %v2988_v6, %v751_v57  ;;  %v771_v53 = vadd.f32 %v2989_v11, %v755_v56  ;;  %v3012_v38 = vld [vmem:[#allocation122_spill] sm:$0xff]  ;;  %p1425_p8 = pnand %p1424_p7, %p1418_p2 }
 0x189   : > { %v775_v5 = vadd.f32 %v2990_v34, %v759_v55  ;;  %v620_v4 = vadd.f32 %v2991_v63, %v604_v60  ;;  %v624_v62 = vadd.f32 %v2992_v43, %v608_v35  ;;  %v628_v30 = vadd.f32 %v2993_v3, %v612_v7 }
 0x18a   : > { %v632_v36 = vadd.f32 %v2994_v20, %v616_v14  ;;  %v779_v46 = vadd.f32 %v2995_v2, %v763_v54  ;;  %v783_v51 = vadd.f32 %v2996_v8, %v767_v17  ;;  %v787_v27 = vadd.f32 %v2997_v37, %v771_v53 }
 0x18b   : > { %v791_v59 = vadd.f32 %v2998_v44, %v775_v5  ;;  %v636_v28 = vadd.f32 %v2999_v42, %v620_v4  ;;  %v640_v0 = vadd.f32 %v3000_v31, %v624_v62  ;;  %v644_v47 = vadd.f32 %v3001_v18, %v628_v30 }
 0x18c   : > { %v648_v41 = vadd.f32 %v3002_v15, %v632_v36  ;;  %v795_v48 = vadd.f32 %v3003_v13, %v779_v46  ;;  %v799_v29 = vadd.f32 %v3004_v39, %v783_v51  ;;  %v803_v49 = vadd.f32 %v3005_v12, %v787_v27 }
 0x18d   : > { %v807_v61 = vadd.f32 %v3006_v1, %v791_v59  ;;  %649 = vst [vmem:[%s387_s28] sm:$0xff] %v636_v28  ;;  %1079 = vst [vmem:[%s387_s28 + $0x8] sm:$0xff] %v640_v0 }
 0x18e   : > { %1080 = vst [vmem:[%s387_s28 + $0x10] sm:$0xff] %v644_v47  ;;  %1081 = vst [vmem:[%s387_s28 + $0x18] sm:$0xff] %v648_v41  ;;  %v811_v58 = vadd.f32 %v3009_v52, %v795_v48  ;;  %v815_v40 = vadd.f32 %v3010_v50, %v799_v29  ;;  %v819_v33 = vadd.f32 %v3011_v45, %v803_v49 }
 0x18f   : > { %v823_v19 = vadd.f32 %v3012_v38, %v807_v61 }
 0x190   : > { %1126 = vst [vmem:[%s387_s28 + $0x20] sm:$0xff] %v811_v58  ;;  %1127 = vst [vmem:[%s387_s28 + $0x28] sm:$0xff] %v815_v40 }
 0x191   : > { %1128 = vst [vmem:[%s387_s28 + $0x30] sm:$0xff] %v819_v33  ;;  %1129 = vst [vmem:[%s387_s28 + $0x38] sm:$0xff] %v823_v19 }
 0x192   : > { %1428 = shalt.err (!%p1425_p8)
}
 0x193   : > { %s1429_s11 = scalar_lea.hbm %s2556_s17, 1024  ;;  %s1433_s25 = scalar_lea.hbm %s3007_s9, 4096 }
 0x194   : > { %p1430_p9 = scmp.ne.s32.totalorder %s2556_s17, %s1429_s11  ;;  %p1434_p6 = scmp.lt.s32.totalorder %s2556_s17, %s3007_s9 }
 0x195   : > { %p1435_p3 = scmp.lt.s32.totalorder %s1433_s25, %s1429_s11 }
 0x196   : > { %p1431_p5 = pnand %p1430_p9, %p3013_p1 }
 0x197   : > { %p1436_p13 = por %p1435_p3, %p1434_p6 }
 0x198   : > { %p1432_p12 = pneg %p1431_p5 }
 0x19a   : > { %p1437_p11 = pnand %p1436_p13, %p1432_p12 }
 0x19c   : > { %1440 = shalt.err (!%p1437_p11)
}
 0x19d   : > { %s1592_s10 = smov 128   ;;  %s1593_s4 = smov 256  }
 0x19e   : > { %s1594_s15 = smov 8  }
 0x19f   : > { %1152 = dma.vmem_to_hbm [thread:$0]  (%p3013_p1), %s2558_s16, 1024, %s2556_s17, %s833_s22, %s1592_s10, %s1593_s4, %s1594_s15  }
 0x1a0 PF: > { %s3014_s2 = sld [smem:[#allocation30_spill]] }
 0x1a1   : > { %s3015_s8 = sld [smem:[#allocation23_spill]] }
 0x1a2   : > { %s3016_s5 = sld [smem:[#allocation34_spill]] }
 0x1a6   : > { %p1180_p0 = scmp.ge.s32.totalorder %s3014_s2, 2 }
 0x1a7   : > { %s862_s19 = sand.u32 1, %s3015_s8  }
 0x1a8   : > { %p3017_p2 = scmp.ne.s32.totalorder %s3016_s5, 0  ;;  %s863_s26 = scalar_lea.sflag [#allocation4], %s862_s19 }
 0x1aa   : > { %p1172_p10 = pnand %p1180_p0, %p3017_p2 }
 0x1ac   : > { %p1173_p4 = pneg %p1172_p10 }
 0x1ae   : > { %1518 = dma.done.wait (%p1173_p4), %s863_s26, 1024  }
 0x1af   : > { %1520 = vsyncadd (%p1173_p4), %s863_s26, 4294966272  ;;  %s26_s6 = sadd.s32 1, %s3014_s2   ;;  %s3019_s23 = sld [smem:[#allocation19_spill]] }
 0x1b0   : > { %p2592_p7 = scmp.ge.s32.totalorder %s26_s6, 6   ;;  %s3020_s19 = sld [smem:[#allocation20_spill]] }
 0x1b1   : > { %s3021_s20 = sld [smem:[#allocation37_spill]] }
 0x1b2   : > { %s3022_s21 = sld [smem:[#allocation21_spill]] }
 0x1b3   : > { %s3023_s22 = sld [smem:[#allocation22_spill]] }
 0x1b4   : > { %s3024_s1 = sld [smem:[#allocation33_spill]] }
 0x1b5   : > { %s3025_s24 = sld [smem:[#allocation24_spill]]  ;;  %s3033_s18 = smov %s3019_s23 }
 0x1b6   : > { %s3026_s25 = sld [smem:[#allocation25_spill]] }
 0x1b7   : > { %s3027_s26 = sld [smem:[#allocation35_spill]]  ;;  %25 = sbr.rel (!%p2592_p7) target bundleno = 21 (0x15), region = 135 }
 0x1b8   : > { %s3028_s27 = sld [smem:[#allocation28_spill]] }
 0x1b9   : > { %s3029_s28 = sld [smem:[#allocation29_spill]] }
 0x1ba   : > { %s3030_s29 = sld [smem:[#allocation31_spill]]  ;;  %s3034_s23 = smov %s3024_s1 }
 0x1bb   : > { %s3031_s30 = sld [smem:[#allocation32_spill]] }
 0x1bc   :  { %868 = vsyncpa [#allocation3], 1 }
 0x1bd   :  { %870 = vsyncpa [#allocation3 + $0x1], 1 }
 0x1be   :  { %871 = vsyncpa [#allocation8], 1 }
 0x1bf   :  { %873 = vsyncpa [#allocation8 + $0x1], 1 }
 0x1c0   :  { %874 = vsyncpa [#allocation4], 1 }
 0x1c1   :  { %876 = vsyncpa [#allocation4 + $0x1], 1 }
 0x1c2   :  { %877 = vsyncpa [#allocation5], 1 }
 0x1c3   :  { %879 = vsyncpa [#allocation5 + $0x1], 1 }
 0x1c4   :  { %880 = vsyncpa [#allocation6], 1 }
 0x1c5   :  { %882 = vsyncpa [#allocation6 + $0x1], 1 }

</bundles_post_ra>
